<compile_context>
chip_gen: v6e
topology: v6e:2x2x1
jax: 0.10.0
libtpu: 0.0.40
codegen_flags: <defaults>
</compile_context>

<pallas_src>
import functools

import jax
import jax.numpy as jnp
from jax import lax
from jax.experimental import pallas as pl
from jax.experimental.pallas import tpu as pltpu

QB = 127.0
EPS = 1e-5


# ----------------------------------------------------------------------------
# Tiling helpers
# ----------------------------------------------------------------------------
def _round_up(x, m):
    return ((x + m - 1) // m) * m


def _choose_tile(dim, target, align):
    """Pick an `align`-aligned divisor of `dim` close to `target`.

    Prefers the largest aligned divisor <= target; if every aligned divisor is
    larger, returns the smallest one (so a ragged dim never silently becomes a
    single giant block).  Falls back to `dim` only when no aligned divisor
    exists (dim < align).
    """
    if dim <= target:
        return dim
    divs = [d for d in range(align, dim + 1, align) if dim % d == 0]
    if not divs:
        return dim  # TODO(synk): pad ragged K/N once at init instead
    le = [d for d in divs if d <= target]
    return max(le) if le else min(divs)


# ----------------------------------------------------------------------------
# Kernel 1: activation quantization pre-pass (per-row absmax -> bf16 codes)
# ----------------------------------------------------------------------------
def _act_quant_kernel(x_ref, xq_ref, g_ref):
    x = x_ref[...]                                              # (tm, K) f32
    g = jnp.maximum(jnp.max(jnp.abs(x), axis=-1, keepdims=True), EPS)
    xq = jnp.clip(jnp.round(x * (QB / g)), -QB - 1.0, QB)       # int codes
    xq_ref[...] = xq.astype(jnp.bfloat16)                       # exact in bf16
    g_ref[...] = g


def act_quant(x2d, row_budget_bytes=8 << 20):
    """x (M, K) f32 -> (bf16 codes (M, K), per-row gamma (M, 1))."""
    M, K = x2d.shape
    per_row_bytes = 6 * K                      # f32 in + bf16 out per row
    target = max(16, min(512, ((row_budget_bytes // max(per_row_bytes, 1)) // 16) * 16))
    tm = _choose_tile(M, target, 16)
    vmem_limit = int(min(max(4 * tm * per_row_bytes, 16 << 20), 48 << 20))
    return pl.pallas_call(
        _act_quant_kernel,
        out_shape=(jax.ShapeDtypeStruct((M, K), jnp.bfloat16),
                   jax.ShapeDtypeStruct((M, 1), jnp.float32)),
        grid=(M // tm,),
        in_specs=[pl.BlockSpec((tm, K), lambda i: (i, 0))],
        out_specs=(pl.BlockSpec((tm, K), lambda i: (i, 0)),
                   pl.BlockSpec((tm, 1), lambda i: (i, 0))),
        compiler_params=pltpu.CompilerParams(
            dimension_semantics=("parallel",),
            vmem_limit_bytes=vmem_limit),
    )(x2d)


# ----------------------------------------------------------------------------
# Kernel 2: K-tiled bf16 matmul with fused dequant / bias / GELU / residual
# ----------------------------------------------------------------------------
def _bit_matmul_kernel(*refs, act, has_residual):
    if has_residual:
        xq_ref, w_ref, g_ref, cs_ref, b_ref, r_ref, o_ref, acc_ref = refs
    else:
        xq_ref, w_ref, g_ref, cs_ref, b_ref, o_ref, acc_ref = refs
        r_ref = None

    k = pl.program_id(2)

    @pl.when(k == 0)
    def _():
        acc_ref[...] = jnp.zeros_like(acc_ref)

    # bf16 codes x bf16 ternary codes -> f32 accumulate (exact integer math)
    acc_ref[...] += jnp.dot(xq_ref[...], w_ref[...],
                            preferred_element_type=jnp.float32)

    @pl.when(k == pl.num_programs(2) - 1)
    def _():
        # dequant epilogue: acc * (gamma/QB per row) * (w_scale per col) + b
        y = acc_ref[...] * g_ref[...] * cs_ref[...] + b_ref[...]
        if act == "gelu":
            # TODO(synk): torch nn.GELU default is exact erf; tanh approx here.
            y = 0.5 * y * (1.0 + jnp.tanh(0.7978845608028654 *
                                          (y + 0.044715 * y * y * y)))
        if has_residual:
            y = y + r_ref[...]
        o_ref[...] = y


def bitlinear(x2d, w_codes_t, col_scale, b, residual=None, act=None,
              tm_target=256, tn_target=512, tk_target=256):
    """y = act( act_quant(x2d) @ (codes * w_scale) + b ) [+ residual].

    x2d: (M, K) f32; w_codes_t: (K, N) bf16 ternary codes (pre-transposed);
    col_scale: (1, N) f32 = w_scale / QB per output column; b: (1, N) f32.
    """
    M0, K = x2d.shape
    K2, N = w_codes_t.shape
    assert K2 == K

    # Row padding keeps bf16 block shapes (16, 128)-friendly.
    M = _round_up(M0, 16)
    if M != M0:
        x2d = jnp.pad(x2d, ((0, M - M0), (0, 0)))
        if residual is not None:
            residual = jnp.pad(residual, ((0, M - M0), (0, 0)))

    # Pass 1: quantize activations once (not once per N tile).
    xq, gamma = act_quant(x2d)

    tm = _choose_tile(M, tm_target, 16)
    tn = _choose_tile(N, tn_target, 128)
    tk = _choose_tile(K, tk_target, 128)
    grid = (M // tm, N // tn, K // tk)

    in_specs = [
        pl.BlockSpec((tm, tk), lambda i, j, k: (i, k)),   # bf16 activation codes
        pl.BlockSpec((tk, tn), lambda i, j, k: (k, j)),   # bf16 ternary codes
        pl.BlockSpec((tm, 1), lambda i, j, k: (i, 0)),    # per-row gamma
        pl.BlockSpec((1, tn), lambda i, j, k: (0, j)),    # per-column w_scale/QB
        pl.BlockSpec((1, tn), lambda i, j, k: (0, j)),    # bias
    ]
    args = [xq, w_codes_t, gamma, col_scale, b]
    if residual is not None:
        in_specs.append(pl.BlockSpec((tm, tn), lambda i, j, k: (i, j)))
        args.append(residual)

    # Double-buffered input/output blocks + single accumulator scratch.
    tile_bytes = (2 * (tm * tk * 2 + tk * tn * 2 + tm * 4 + 2 * tn * 4
                       + ((tm * tn * 4) if residual is not None else 0)
                       + tm * tn * 4)
                  + tm * tn * 4)
    vmem_limit = int(min(max(2 * tile_bytes, 16 << 20), 48 << 20))

    out = pl.pallas_call(
        functools.partial(_bit_matmul_kernel, act=act,
                          has_residual=residual is not None),
        out_shape=jax.ShapeDtypeStruct((M, N), jnp.float32),
        grid=grid,
        in_specs=in_specs,
        out_specs=pl.BlockSpec((tm, tn), lambda i, j, k: (i, j)),
        scratch_shapes=[pltpu.VMEM((tm, tn), jnp.float32)],
        compiler_params=pltpu.CompilerParams(
            dimension_semantics=("parallel", "parallel", "arbitrary"),
            vmem_limit_bytes=vmem_limit),
    )(*args)
    return out[:M0] if M != M0 else out


# ----------------------------------------------------------------------------
# Kernel 3: multi-head attention over the fused per-head-interleaved qkv
# ----------------------------------------------------------------------------
def _attn_kernel(qkv_ref, o_ref, *, heads, dim, scale):
    # One batch element per grid step; qkv columns laid out [q_h | k_h | v_h]
    # per head so each head reads one contiguous 3*Dh slice off the ref.
    # TODO(synk): flash-style (batch, q_tile, kv_tile) tiling with online
    # softmax + a heads grid axis for realistic S / head counts.
    dh = dim // heads
    outs = []
    for h in range(heads):
        base = 3 * dh * h
        q = (qkv_ref[:, base:base + dh] * scale).astype(jnp.bfloat16)   # (S, Dh)
        k = qkv_ref[:, base + dh:base + 2 * dh].astype(jnp.bfloat16)
        v = qkv_ref[:, base + 2 * dh:base + 3 * dh].astype(jnp.bfloat16)
        # contract Dh on both sides -> (S, S); no in-kernel transpose of k.
        s = lax.dot_general(q, k, (((1,), (1,)), ((), ())),
                            preferred_element_type=jnp.float32)
        m = jnp.max(s, axis=-1, keepdims=True)
        p = jnp.exp(s - m)
        l = jnp.sum(p, axis=-1, keepdims=True)
        o = jnp.dot(p.astype(jnp.bfloat16), v,
                    preferred_element_type=jnp.float32)                  # (S, Dh)
        # normalize the (S, Dh) output, not the (S, S) score matrix
        outs.append(o * pl.reciprocal(l, approx=True))
    # single lane-dense store of all heads (standard concat-head layout)
    o_ref[...] = jnp.concatenate(outs, axis=-1)


def attention(qkv, *, batch, seq, dim, heads):
    scale = 1.0 / float(dim // heads) ** 0.5
    return pl.pallas_call(
        functools.partial(_attn_kernel, heads=heads, dim=dim, scale=scale),
        out_shape=jax.ShapeDtypeStruct((batch * seq, dim), jnp.float32),
        grid=(batch,),
        in_specs=[pl.BlockSpec((seq, 3 * dim), lambda b: (b, 0))],
        out_specs=pl.BlockSpec((seq, dim), lambda b: (b, 0)),
        compiler_params=pltpu.CompilerParams(
            dimension_semantics=("parallel",)),
    )(qkv)


# ----------------------------------------------------------------------------
# Parameter setup (JAX glue)
# ----------------------------------------------------------------------------
def weight_quant_codes(w):
    """BitNet b1.58 ternary quant: codes in {-1,0,+1} plus mean-abs scale."""
    scale = jnp.maximum(jnp.mean(jnp.abs(w)), EPS)
    codes = jnp.clip(jnp.round(w / scale), -1.0, 1.0)
    return codes, scale


def init_params(key, dim, heads, depth, ff_mult):
    hidden = dim * ff_mult
    dh = dim // heads
    layers = []
    for d in range(depth):
        ks = jax.random.split(jax.random.fold_in(key, d), 6)

        def lin(k, n_in, n_out):
            # ternary codes stored pre-transposed (K, N) in bf16 (lane-dense
            # MXU RHS, exact {-1,0,+1}); w_scale/QB kept as a per-column f32
            # vector folded into the matmul epilogue.
            # TODO(synk): int8 code storage + int8 MXU path on v5e/v6e.
            w = 0.02 * jax.random.normal(k, (n_out, n_in), jnp.float32)
            codes, scale = weight_quant_codes(w)
            w_t = codes.T.astype(jnp.bfloat16)                    # (n_in, n_out)
            cs = jnp.full((1, n_out), scale / QB, jnp.float32)
            b = jnp.zeros((1, n_out), jnp.float32)
            return w_t, cs, b

        wq, csq, bq = lin(ks[0], dim, dim)
        wk, csk, bk = lin(ks[1], dim, dim)
        wv, csv, bv = lin(ks[2], dim, dim)
        wo, cso, bo = lin(ks[3], dim, dim)
        w1, cs1, b1 = lin(ks[4], dim, hidden)
        w2, cs2, b2 = lin(ks[5], hidden, dim)

        # Fuse q/k/v into one (dim, 3*dim) projection with per-head interleaved
        # columns [q_h | k_h | v_h] (contiguous per-head slice in attention).
        def interleave(a, b_, c):
            return jnp.concatenate(
                [jnp.concatenate([a[:, h * dh:(h + 1) * dh],
                                  b_[:, h * dh:(h + 1) * dh],
                                  c[:, h * dh:(h + 1) * dh]], axis=1)
                 for h in range(heads)], axis=1)

        layers.append(dict(
            attn=dict(w_qkv=interleave(wq, wk, wv),
                      cs_qkv=interleave(csq, csk, csv),
                      b_qkv=interleave(bq, bk, bv),
                      wo=wo, cso=cso, bo=bo),
            ffn=dict(w1=w1, cs1=cs1, b1=b1, w2=w2, cs2=cs2, b2=b2),
        ))
    return layers


# ----------------------------------------------------------------------------
# Module forward (glue around the kernels)
# ----------------------------------------------------------------------------
def bit_attention(x, p, heads, residual):
    """BitAttention(x) + residual (residual add fused into the out-proj)."""
    B, S, D = x.shape
    M = B * S
    xf = x.reshape(M, D)
    qkv = bitlinear(xf, p["w_qkv"], p["cs_qkv"], p["b_qkv"])        # (M, 3D)
    attn = attention(qkv, batch=B, seq=S, dim=D, heads=heads)       # (M, D)
    out = bitlinear(attn, p["wo"], p["cso"], p["bo"],
                    residual=residual.reshape(M, D))
    return out.reshape(B, S, D)


def bit_feedforward(x, p, residual):
    """BitFeedForward(x) + residual (residual add fused into the 2nd linear)."""
    B, S, D = x.shape
    M = B * S
    xf = x.reshape(M, D)
    h = bitlinear(xf, p["w1"], p["cs1"], p["b1"], act="gelu")       # (M, 4D)
    y = bitlinear(h, p["w2"], p["cs2"], p["b2"],
                  residual=residual.reshape(M, D))
    return y.reshape(B, S, D)


def transformer_forward(x, params, heads):
    # Matches the reference: `skip` is the ORIGINAL input for every layer.
    # TODO(synk): the reference's self.cache activation stash is not modeled.
    skip = x
    for layer in params:
        x = bit_attention(x, layer["attn"], heads, residual=skip)   # attn(x)+skip
        x = bit_feedforward(x, layer["ffn"], residual=x)            # ffn(x)+x
    return x


# ----------------------------------------------------------------------------
if __name__ == "__main__":
    B, S, DIM, HEADS, DEPTH, FF_MULT = 2, 8, 32, 4, 1, 4

    key = jax.random.PRNGKey(0)
    kx, kp = jax.random.split(key)
    x = jax.random.normal(kx, (B, S, DIM), jnp.float32)
    params = init_params(kp, DIM, HEADS, DEPTH, FF_MULT)

    fwd = jax.jit(functools.partial(transformer_forward, heads=HEADS))
    y = fwd(x, params)
    y = jax.block_until_ready(y)

    assert y.shape == (B, S, DIM)
    assert jnp.all(jnp.isfinite(y))
    print("KERNEL_OK")
</pallas_src>

<mosaic_0001>
module attributes {stable_mosaic.version = 11 : i64} {
  func.func @_bit_matmul_kernel(%arg0: i32, %arg1: i32, %arg2: i32, %arg3: memref<16x32xbf16, #tpu.memory_space<vmem>>, %arg4: memref<32x96xbf16, #tpu.memory_space<vmem>>, %arg5: memref<16x1xf32, #tpu.memory_space<vmem>>, %arg6: memref<1x96xf32, #tpu.memory_space<vmem>>, %arg7: memref<1x96xf32, #tpu.memory_space<vmem>>, %arg8: memref<16x96xf32, #tpu.memory_space<vmem>>, %arg9: memref<16x96xf32, #tpu.memory_space<vmem>>) attributes {dimension_semantics = [#tpu.dimension_semantics<parallel>, #tpu.dimension_semantics<parallel>, #tpu.dimension_semantics<arbitrary>], iteration_bounds = array<i64: 1, 1, 1>, scalar_prefetch = 0 : i64, scratch_operands = 1 : i64, tpu.core_type = #tpu.core_type<tc>, window_params = [{transform_indices = @transform_0, window_bounds = array<i64: 16, 32>}, {transform_indices = @transform_1, window_bounds = array<i64: 32, 96>}, {transform_indices = @transform_2, window_bounds = array<i64: 16, 1>}, {transform_indices = @transform_3, window_bounds = array<i64: 1, 96>}, {transform_indices = @transform_4, window_bounds = array<i64: 1, 96>}, {transform_indices = @transform_5, window_bounds = array<i64: 16, 96>}]} {
    %c0_i32 = arith.constant 0 : i32
    %0 = arith.cmpi eq, %arg2, %c0_i32 : i32
    %1 = arith.extui %0 : i1 to i32
    %c0_i32_0 = arith.constant 0 : i32
    %2 = arith.cmpi ne, %1, %c0_i32_0 : i32
    scf.if %2 {
      %cst_10 = arith.constant 0.000000e+00 : f32
      %12 = vector.broadcast %cst_10 : f32 to vector<16x96xf32>
      %c0_11 = arith.constant 0 : index
      %c0_12 = arith.constant 0 : index
      %13 = vector.load %arg9[%c0_11, %c0_12] : memref<16x96xf32, #tpu.memory_space<vmem>>, vector<16x96xf32>
      tpu.vector_store %arg9[%c0_11, %c0_12], %12 {strides = array<i32>} : memref<16x96xf32, #tpu.memory_space<vmem>>, vector<16x96xf32>,
    } else {
    }
    %c0 = arith.constant 0 : index
    %c0_1 = arith.constant 0 : index
    %3 = vector.load %arg9[%c0, %c0_1] : memref<16x96xf32, #tpu.memory_space<vmem>>, vector<16x96xf32>
    %c0_2 = arith.constant 0 : index
    %c0_3 = arith.constant 0 : index
    %4 = vector.load %arg3[%c0_2, %c0_3] : memref<16x32xbf16, #tpu.memory_space<vmem>>, vector<16x32xbf16>
    %c0_4 = arith.constant 0 : index
    %c0_5 = arith.constant 0 : index
    %5 = vector.load %arg4[%c0_4, %c0_5] : memref<32x96xbf16, #tpu.memory_space<vmem>>, vector<32x96xbf16>
    %cst = arith.constant dense<0.000000e+00> : vector<16x96xf32>
    %6 = tpu.matmul %4, %5, %cst {dimension_numbers = #tpu.dot_dimension_numbers<[1], [0], [0], [1], [0, 0, 1, 1], [], []>} : vector<16x32xbf16>, vector<32x96xbf16>, vector<16x96xf32> -> vector<16x96xf32>
    %7 = arith.addf %3, %6 : vector<16x96xf32>
    %c0_6 = arith.constant 0 : index
    %c0_7 = arith.constant 0 : index
    %8 = vector.load %arg9[%c0_6, %c0_7] : memref<16x96xf32, #tpu.memory_space<vmem>>, vector<16x96xf32>
    tpu.vector_store %arg9[%c0_6, %c0_7], %7 {strides = array<i32>} : memref<16x96xf32, #tpu.memory_space<vmem>>, vector<16x96xf32>,
    %c0_i32_8 = arith.constant 0 : i32
    %9 = arith.cmpi eq, %arg2, %c0_i32_8 : i32
    %10 = arith.extui %9 : i1 to i32
    %c0_i32_9 = arith.constant 0 : i32
    %11 = arith.cmpi ne, %10, %c0_i32_9 : i32
    scf.if %11 {
      %c0_10 = arith.constant 0 : index
      %c0_11 = arith.constant 0 : index
      %12 = vector.load %arg9[%c0_10, %c0_11] : memref<16x96xf32, #tpu.memory_space<vmem>>, vector<16x96xf32>
      %c0_12 = arith.constant 0 : index
      %c0_13 = arith.constant 0 : index
      %13 = vector.load %arg5[%c0_12, %c0_13] : memref<16x1xf32, #tpu.memory_space<vmem>>, vector<16x1xf32>
      %14 = vector.broadcast %13 : vector<16x1xf32> to vector<16x96xf32>
      %15 = arith.mulf %12, %14 : vector<16x96xf32>
      %c0_14 = arith.constant 0 : index
      %c0_15 = arith.constant 0 : index
      %16 = vector.load %arg6[%c0_14, %c0_15] : memref<1x96xf32, #tpu.memory_space<vmem>>, vector<1x96xf32>
      %17 = vector.broadcast %16 : vector<1x96xf32> to vector<16x96xf32>
      %18 = arith.mulf %15, %17 : vector<16x96xf32>
      %c0_16 = arith.constant 0 : index
      %c0_17 = arith.constant 0 : index
      %19 = vector.load %arg7[%c0_16, %c0_17] : memref<1x96xf32, #tpu.memory_space<vmem>>, vector<1x96xf32>
      %20 = vector.broadcast %19 : vector<1x96xf32> to vector<16x96xf32>
      %21 = arith.addf %18, %20 : vector<16x96xf32>
      %c0_18 = arith.constant 0 : index
      %c0_19 = arith.constant 0 : index
      %22 = vector.load %arg8[%c0_18, %c0_19] : memref<16x96xf32, #tpu.memory_space<vmem>>, vector<16x96xf32>
      tpu.vector_store %arg8[%c0_18, %c0_19], %21 {strides = array<i32>} : memref<16x96xf32, #tpu.memory_space<vmem>>, vector<16x96xf32>,
    } else {
    }
    return
  }
  func.func @transform_0(%arg0: i32, %arg1: i32, %arg2: i32) -> (i32, i32) {
    %c0_i32 = arith.constant 0 : i32
    return %arg0, %arg2 : i32, i32
  }
  func.func @transform_1(%arg0: i32, %arg1: i32, %arg2: i32) -> (i32, i32) {
    %c0_i32 = arith.constant 0 : i32
    return %arg2, %arg1 : i32, i32
  }
  func.func @transform_2(%arg0: i32, %arg1: i32, %arg2: i32) -> (i32, i32) {
    %c0_i32 = arith.constant 0 : i32
    %c0_i32_0 = arith.constant 0 : i32
    return %arg0, %c0_i32 : i32, i32
  }
  func.func @transform_3(%arg0: i32, %arg1: i32, %arg2: i32) -> (i32, i32) {
    %c0_i32 = arith.constant 0 : i32
    %c0_i32_0 = arith.constant 0 : i32
    return %c0_i32, %arg1 : i32, i32
  }
  func.func @transform_4(%arg0: i32, %arg1: i32, %arg2: i32) -> (i32, i32) {
    %c0_i32 = arith.constant 0 : i32
    %c0_i32_0 = arith.constant 0 : i32
    return %c0_i32, %arg1 : i32, i32
  }
  func.func @transform_5(%arg0: i32, %arg1: i32, %arg2: i32) -> (i32, i32) {
    %c0_i32 = arith.constant 0 : i32
    return %arg0, %arg1 : i32, i32
  }
}

module attributes {stable_mosaic.version = 11 : i64} {
  func.func @_act_quant_kernel(%arg0: i32, %arg1: memref<16x32xf32, #tpu.memory_space<vmem>>, %arg2: memref<16x32xbf16, #tpu.memory_space<vmem>>, %arg3: memref<16x1xf32, #tpu.memory_space<vmem>>) attributes {dimension_semantics = [#tpu.dimension_semantics<parallel>], iteration_bounds = array<i64: 1>, scalar_prefetch = 0 : i64, scratch_operands = 0 : i64, tpu.core_type = #tpu.core_type<tc>, window_params = [{transform_indices = @transform_0, window_bounds = array<i64: 16, 32>}, {transform_indices = @transform_1, window_bounds = array<i64: 16, 32>}, {transform_indices = @transform_2, window_bounds = array<i64: 16, 1>}]} {
    %c0 = arith.constant 0 : index
    %c0_0 = arith.constant 0 : index
    %0 = vector.load %arg1[%c0, %c0_0] : memref<16x32xf32, #tpu.memory_space<vmem>>, vector<16x32xf32>
    %1 = math.absf %0 : vector<16x32xf32>
    %cst = arith.constant dense<0xFF800000> : vector<16xf32>
    %2 = vector.multi_reduction <maximumf>, %1, %cst [1] : vector<16x32xf32> to vector<16xf32>
    %3 = vector.shape_cast %2 : vector<16xf32> to vector<16x1xf32>
    %cst_1 = arith.constant 9.99999974E-6 : f32
    %4 = vector.broadcast %cst_1 : f32 to vector<16x1xf32>
    %5 = arith.maximumf %3, %4 : vector<16x1xf32>
    %cst_2 = arith.constant 1.270000e+02 : f32
    %6 = vector.broadcast %cst_2 : f32 to vector<16x1xf32>
    %7 = arith.divf %6, %5 : vector<16x1xf32>
    %8 = vector.broadcast %7 : vector<16x1xf32> to vector<16x32xf32>
    %9 = arith.mulf %0, %8 : vector<16x32xf32>
    %10 = math.roundeven %9 : vector<16x32xf32>
    %cst_3 = arith.constant -1.280000e+02 : f32
    %cst_4 = arith.constant 1.270000e+02 : f32
    %11 = vector.broadcast %cst_3 : f32 to vector<16x32xf32>
    %12 = arith.maximumf %11, %10 : vector<16x32xf32>
    %13 = vector.broadcast %cst_4 : f32 to vector<16x32xf32>
    %14 = arith.minimumf %13, %12 : vector<16x32xf32>
    %15 = arith.truncf %14 : vector<16x32xf32> to vector<16x32xbf16>
    %c0_5 = arith.constant 0 : index
    %c0_6 = arith.constant 0 : index
    %16 = vector.load %arg2[%c0_5, %c0_6] : memref<16x32xbf16, #tpu.memory_space<vmem>>, vector<16x32xbf16>
    tpu.vector_store %arg2[%c0_5, %c0_6], %15 {strides = array<i32>} : memref<16x32xbf16, #tpu.memory_space<vmem>>, vector<16x32xbf16>,
    %c0_7 = arith.constant 0 : index
    %c0_8 = arith.constant 0 : index
    %17 = vector.load %arg3[%c0_7, %c0_8] : memref<16x1xf32, #tpu.memory_space<vmem>>, vector<16x1xf32>
    tpu.vector_store %arg3[%c0_7, %c0_8], %5 {strides = array<i32>} : memref<16x1xf32, #tpu.memory_space<vmem>>, vector<16x1xf32>,
    return
  }
  func.func @transform_0(%arg0: i32) -> (i32, i32) {
    %c0_i32 = arith.constant 0 : i32
    %c0_i32_0 = arith.constant 0 : i32
    return %arg0, %c0_i32 : i32, i32
  }
  func.func @transform_1(%arg0: i32) -> (i32, i32) {
    %c0_i32 = arith.constant 0 : i32
    %c0_i32_0 = arith.constant 0 : i32
    return %arg0, %c0_i32 : i32, i32
  }
  func.func @transform_2(%arg0: i32) -> (i32, i32) {
    %c0_i32 = arith.constant 0 : i32
    %c0_i32_0 = arith.constant 0 : i32
    return %arg0, %c0_i32 : i32, i32
  }
}

module attributes {stable_mosaic.version = 11 : i64} {
  func.func @_act_quant_kernel(%arg0: i32, %arg1: memref<16x32xf32, #tpu.memory_space<vmem>>, %arg2: memref<16x32xbf16, #tpu.memory_space<vmem>>, %arg3: memref<16x1xf32, #tpu.memory_space<vmem>>) attributes {dimension_semantics = [#tpu.dimension_semantics<parallel>], iteration_bounds = array<i64: 1>, scalar_prefetch = 0 : i64, scratch_operands = 0 : i64, tpu.core_type = #tpu.core_type<tc>, window_params = [{transform_indices = @transform_0, window_bounds = array<i64: 16, 32>}, {transform_indices = @transform_1, window_bounds = array<i64: 16, 32>}, {transform_indices = @transform_2, window_bounds = array<i64: 16, 1>}]} {
    %c0 = arith.constant 0 : index
    %c0_0 = arith.constant 0 : index
    %0 = vector.load %arg1[%c0, %c0_0] : memref<16x32xf32, #tpu.memory_space<vmem>>, vector<16x32xf32>
    %1 = math.absf %0 : vector<16x32xf32>
    %cst = arith.constant dense<0xFF800000> : vector<16xf32>
    %2 = vector.multi_reduction <maximumf>, %1, %cst [1] : vector<16x32xf32> to vector<16xf32>
    %3 = vector.shape_cast %2 : vector<16xf32> to vector<16x1xf32>
    %cst_1 = arith.constant 9.99999974E-6 : f32
    %4 = vector.broadcast %cst_1 : f32 to vector<16x1xf32>
    %5 = arith.maximumf %3, %4 : vector<16x1xf32>
    %cst_2 = arith.constant 1.270000e+02 : f32
    %6 = vector.broadcast %cst_2 : f32 to vector<16x1xf32>
    %7 = arith.divf %6, %5 : vector<16x1xf32>
    %8 = vector.broadcast %7 : vector<16x1xf32> to vector<16x32xf32>
    %9 = arith.mulf %0, %8 : vector<16x32xf32>
    %10 = math.roundeven %9 : vector<16x32xf32>
    %cst_3 = arith.constant -1.280000e+02 : f32
    %cst_4 = arith.constant 1.270000e+02 : f32
    %11 = vector.broadcast %cst_3 : f32 to vector<16x32xf32>
    %12 = arith.maximumf %11, %10 : vector<16x32xf32>
    %13 = vector.broadcast %cst_4 : f32 to vector<16x32xf32>
    %14 = arith.minimumf %13, %12 : vector<16x32xf32>
    %15 = arith.truncf %14 : vector<16x32xf32> to vector<16x32xbf16>
    %c0_5 = arith.constant 0 : index
    %c0_6 = arith.constant 0 : index
    %16 = vector.load %arg2[%c0_5, %c0_6] : memref<16x32xbf16, #tpu.memory_space<vmem>>, vector<16x32xbf16>
    tpu.vector_store %arg2[%c0_5, %c0_6], %15 {strides = array<i32>} : memref<16x32xbf16, #tpu.memory_space<vmem>>, vector<16x32xbf16>,
    %c0_7 = arith.constant 0 : index
    %c0_8 = arith.constant 0 : index
    %17 = vector.load %arg3[%c0_7, %c0_8] : memref<16x1xf32, #tpu.memory_space<vmem>>, vector<16x1xf32>
    tpu.vector_store %arg3[%c0_7, %c0_8], %5 {strides = array<i32>} : memref<16x1xf32, #tpu.memory_space<vmem>>, vector<16x1xf32>,
    return
  }
  func.func @transform_0(%arg0: i32) -> (i32, i32) {
    %c0_i32 = arith.constant 0 : i32
    %c0_i32_0 = arith.constant 0 : i32
    return %arg0, %c0_i32 : i32, i32
  }
  func.func @transform_1(%arg0: i32) -> (i32, i32) {
    %c0_i32 = arith.constant 0 : i32
    %c0_i32_0 = arith.constant 0 : i32
    return %arg0, %c0_i32 : i32, i32
  }
  func.func @transform_2(%arg0: i32) -> (i32, i32) {
    %c0_i32 = arith.constant 0 : i32
    %c0_i32_0 = arith.constant 0 : i32
    return %arg0, %c0_i32 : i32, i32
  }
}

module attributes {stable_mosaic.version = 11 : i64} {
  func.func @_attn_kernel(%arg0: i32, %arg1: memref<8x96xf32, #tpu.memory_space<vmem>>, %arg2: memref<8x32xf32, #tpu.memory_space<vmem>>) attributes {dimension_semantics = [#tpu.dimension_semantics<parallel>], iteration_bounds = array<i64: 2>, scalar_prefetch = 0 : i64, scratch_operands = 0 : i64, tpu.core_type = #tpu.core_type<tc>, window_params = [{transform_indices = @transform_0, window_bounds = array<i64: 8, 96>}, {transform_indices = @transform_1, window_bounds = array<i64: 8, 32>}]} {
    %c0 = arith.constant 0 : index
    %c0_0 = arith.constant 0 : index
    %0 = vector.load %arg1[%c0, %c0_0] : memref<8x96xf32, #tpu.memory_space<vmem>>, vector<8x8xf32>
    %cst = arith.constant 0.353553385 : f32
    %1 = vector.broadcast %cst : f32 to vector<8x8xf32>
    %2 = arith.mulf %0, %1 : vector<8x8xf32>
    %3 = arith.truncf %2 : vector<8x8xf32> to vector<8x8xbf16>
    %c0_1 = arith.constant 0 : index
    %c8 = arith.constant 8 : index
    %4 = vector.load %arg1[%c0_1, %c8] : memref<8x96xf32, #tpu.memory_space<vmem>>, vector<8x8xf32>
    %5 = arith.truncf %4 : vector<8x8xf32> to vector<8x8xbf16>
    %c0_2 = arith.constant 0 : index
    %c16 = arith.constant 16 : index
    %6 = vector.load %arg1[%c0_2, %c16] : memref<8x96xf32, #tpu.memory_space<vmem>>, vector<8x8xf32>
    %7 = arith.truncf %6 : vector<8x8xf32> to vector<8x8xbf16>
    %cst_3 = arith.constant dense<0.000000e+00> : vector<8x8xf32>
    %8 = tpu.matmul %3, %5, %cst_3 {dimension_numbers = #tpu.dot_dimension_numbers<[1], [1], [0], [0], [0, 0, 1, 0], [], []>} : vector<8x8xbf16>, vector<8x8xbf16>, vector<8x8xf32> -> vector<8x8xf32>
    %cst_4 = arith.constant dense<0xFF800000> : vector<8xf32>
    %9 = vector.multi_reduction <maximumf>, %8, %cst_4 [1] : vector<8x8xf32> to vector<8xf32>
    %10 = vector.shape_cast %9 : vector<8xf32> to vector<8x1xf32>
    %11 = vector.broadcast %10 : vector<8x1xf32> to vector<8x8xf32>
    %12 = arith.subf %8, %11 : vector<8x8xf32>
    %13 = math.exp %12 : vector<8x8xf32>
    %cst_5 = arith.constant dense<0.000000e+00> : vector<8xf32>
    %14 = vector.multi_reduction <add>, %13, %cst_5 [1] : vector<8x8xf32> to vector<8xf32>
    %15 = vector.shape_cast %14 : vector<8xf32> to vector<8x1xf32>
    %16 = arith.truncf %13 : vector<8x8xf32> to vector<8x8xbf16>
    %cst_6 = arith.constant dense<0.000000e+00> : vector<8x8xf32>
    %17 = tpu.matmul %16, %7, %cst_6 {dimension_numbers = #tpu.dot_dimension_numbers<[1], [0], [0], [1], [0, 0, 1, 1], [], []>} : vector<8x8xbf16>, vector<8x8xbf16>, vector<8x8xf32> -> vector<8x8xf32>
    %18 = tpu.reciprocal %15 {approx = true} : vector<8x1xf32> -> vector<8x1xf32>
    %19 = vector.broadcast %18 : vector<8x1xf32> to vector<8x8xf32>
    %20 = arith.mulf %17, %19 : vector<8x8xf32>
    %c0_7 = arith.constant 0 : index
    %c24 = arith.constant 24 : index
    %21 = vector.load %arg1[%c0_7, %c24] : memref<8x96xf32, #tpu.memory_space<vmem>>, vector<8x8xf32>
    %cst_8 = arith.constant 0.353553385 : f32
    %22 = vector.broadcast %cst_8 : f32 to vector<8x8xf32>
    %23 = arith.mulf %21, %22 : vector<8x8xf32>
    %24 = arith.truncf %23 : vector<8x8xf32> to vector<8x8xbf16>
    %c0_9 = arith.constant 0 : index
    %c32 = arith.constant 32 : index
    %25 = vector.load %arg1[%c0_9, %c32] : memref<8x96xf32, #tpu.memory_space<vmem>>, vector<8x8xf32>
    %26 = arith.truncf %25 : vector<8x8xf32> to vector<8x8xbf16>
    %c0_10 = arith.constant 0 : index
    %c40 = arith.constant 40 : index
    %27 = vector.load %arg1[%c0_10, %c40] : memref<8x96xf32, #tpu.memory_space<vmem>>, vector<8x8xf32>
    %28 = arith.truncf %27 : vector<8x8xf32> to vector<8x8xbf16>
    %cst_11 = arith.constant dense<0.000000e+00> : vector<8x8xf32>
    %29 = tpu.matmul %24, %26, %cst_11 {dimension_numbers = #tpu.dot_dimension_numbers<[1], [1], [0], [0], [0, 0, 1, 0], [], []>} : vector<8x8xbf16>, vector<8x8xbf16>, vector<8x8xf32> -> vector<8x8xf32>
    %cst_12 = arith.constant dense<0xFF800000> : vector<8xf32>
    %30 = vector.multi_reduction <maximumf>, %29, %cst_12 [1] : vector<8x8xf32> to vector<8xf32>
    %31 = vector.shape_cast %30 : vector<8xf32> to vector<8x1xf32>
    %32 = vector.broadcast %31 : vector<8x1xf32> to vector<8x8xf32>
    %33 = arith.subf %29, %32 : vector<8x8xf32>
    %34 = math.exp %33 : vector<8x8xf32>
    %cst_13 = arith.constant dense<0.000000e+00> : vector<8xf32>
    %35 = vector.multi_reduction <add>, %34, %cst_13 [1] : vector<8x8xf32> to vector<8xf32>
    %36 = vector.shape_cast %35 : vector<8xf32> to vector<8x1xf32>
    %37 = arith.truncf %34 : vector<8x8xf32> to vector<8x8xbf16>
    %cst_14 = arith.constant dense<0.000000e+00> : vector<8x8xf32>
    %38 = tpu.matmul %37, %28, %cst_14 {dimension_numbers = #tpu.dot_dimension_numbers<[1], [0], [0], [1], [0, 0, 1, 1], [], []>} : vector<8x8xbf16>, vector<8x8xbf16>, vector<8x8xf32> -> vector<8x8xf32>
    %39 = tpu.reciprocal %36 {approx = true} : vector<8x1xf32> -> vector<8x1xf32>
    %40 = vector.broadcast %39 : vector<8x1xf32> to vector<8x8xf32>
    %41 = arith.mulf %38, %40 : vector<8x8xf32>
    %c0_15 = arith.constant 0 : index
    %c48 = arith.constant 48 : index
    %42 = vector.load %arg1[%c0_15, %c48] : memref<8x96xf32, #tpu.memory_space<vmem>>, vector<8x8xf32>
    %cst_16 = arith.constant 0.353553385 : f32
    %43 = vector.broadcast %cst_16 : f32 to vector<8x8xf32>
    %44 = arith.mulf %42, %43 : vector<8x8xf32>
    %45 = arith.truncf %44 : vector<8x8xf32> to vector<8x8xbf16>
    %c0_17 = arith.constant 0 : index
    %c56 = arith.constant 56 : index
    %46 = vector.load %arg1[%c0_17, %c56] : memref<8x96xf32, #tpu.memory_space<vmem>>, vector<8x8xf32>
    %47 = arith.truncf %46 : vector<8x8xf32> to vector<8x8xbf16>
    %c0_18 = arith.constant 0 : index
    %c64 = arith.constant 64 : index
    %48 = vector.load %arg1[%c0_18, %c64] : memref<8x96xf32, #tpu.memory_space<vmem>>, vector<8x8xf32>
    %49 = arith.truncf %48 : vector<8x8xf32> to vector<8x8xbf16>
    %cst_19 = arith.constant dense<0.000000e+00> : vector<8x8xf32>
    %50 = tpu.matmul %45, %47, %cst_19 {dimension_numbers = #tpu.dot_dimension_numbers<[1], [1], [0], [0], [0, 0, 1, 0], [], []>} : vector<8x8xbf16>, vector<8x8xbf16>, vector<8x8xf32> -> vector<8x8xf32>
    %cst_20 = arith.constant dense<0xFF800000> : vector<8xf32>
    %51 = vector.multi_reduction <maximumf>, %50, %cst_20 [1] : vector<8x8xf32> to vector<8xf32>
    %52 = vector.shape_cast %51 : vector<8xf32> to vector<8x1xf32>
    %53 = vector.broadcast %52 : vector<8x1xf32> to vector<8x8xf32>
    %54 = arith.subf %50, %53 : vector<8x8xf32>
    %55 = math.exp %54 : vector<8x8xf32>
    %cst_21 = arith.constant dense<0.000000e+00> : vector<8xf32>
    %56 = vector.multi_reduction <add>, %55, %cst_21 [1] : vector<8x8xf32> to vector<8xf32>
    %57 = vector.shape_cast %56 : vector<8xf32> to vector<8x1xf32>
    %58 = arith.truncf %55 : vector<8x8xf32> to vector<8x8xbf16>
    %cst_22 = arith.constant dense<0.000000e+00> : vector<8x8xf32>
    %59 = tpu.matmul %58, %49, %cst_22 {dimension_numbers = #tpu.dot_dimension_numbers<[1], [0], [0], [1], [0, 0, 1, 1], [], []>} : vector<8x8xbf16>, vector<8x8xbf16>, vector<8x8xf32> -> vector<8x8xf32>
    %60 = tpu.reciprocal %57 {approx = true} : vector<8x1xf32> -> vector<8x1xf32>
    %61 = vector.broadcast %60 : vector<8x1xf32> to vector<8x8xf32>
    %62 = arith.mulf %59, %61 : vector<8x8xf32>
    %c0_23 = arith.constant 0 : index
    %c72 = arith.constant 72 : index
    %63 = vector.load %arg1[%c0_23, %c72] : memref<8x96xf32, #tpu.memory_space<vmem>>, vector<8x8xf32>
    %cst_24 = arith.constant 0.353553385 : f32
    %64 = vector.broadcast %cst_24 : f32 to vector<8x8xf32>
    %65 = arith.mulf %63, %64 : vector<8x8xf32>
    %66 = arith.truncf %65 : vector<8x8xf32> to vector<8x8xbf16>
    %c0_25 = arith.constant 0 : index
    %c80 = arith.constant 80 : index
    %67 = vector.load %arg1[%c0_25, %c80] : memref<8x96xf32, #tpu.memory_space<vmem>>, vector<8x8xf32>
    %68 = arith.truncf %67 : vector<8x8xf32> to vector<8x8xbf16>
    %c0_26 = arith.constant 0 : index
    %c88 = arith.constant 88 : index
    %69 = vector.load %arg1[%c0_26, %c88] : memref<8x96xf32, #tpu.memory_space<vmem>>, vector<8x8xf32>
    %70 = arith.truncf %69 : vector<8x8xf32> to vector<8x8xbf16>
    %cst_27 = arith.constant dense<0.000000e+00> : vector<8x8xf32>
    %71 = tpu.matmul %66, %68, %cst_27 {dimension_numbers = #tpu.dot_dimension_numbers<[1], [1], [0], [0], [0, 0, 1, 0], [], []>} : vector<8x8xbf16>, vector<8x8xbf16>, vector<8x8xf32> -> vector<8x8xf32>
    %cst_28 = arith.constant dense<0xFF800000> : vector<8xf32>
    %72 = vector.multi_reduction <maximumf>, %71, %cst_28 [1] : vector<8x8xf32> to vector<8xf32>
    %73 = vector.shape_cast %72 : vector<8xf32> to vector<8x1xf32>
    %74 = vector.broadcast %73 : vector<8x1xf32> to vector<8x8xf32>
    %75 = arith.subf %71, %74 : vector<8x8xf32>
    %76 = math.exp %75 : vector<8x8xf32>
    %cst_29 = arith.constant dense<0.000000e+00> : vector<8xf32>
    %77 = vector.multi_reduction <add>, %76, %cst_29 [1] : vector<8x8xf32> to vector<8xf32>
    %78 = vector.shape_cast %77 : vector<8xf32> to vector<8x1xf32>
    %79 = arith.truncf %76 : vector<8x8xf32> to vector<8x8xbf16>
    %cst_30 = arith.constant dense<0.000000e+00> : vector<8x8xf32>
    %80 = tpu.matmul %79, %70, %cst_30 {dimension_numbers = #tpu.dot_dimension_numbers<[1], [0], [0], [1], [0, 0, 1, 1], [], []>} : vector<8x8xbf16>, vector<8x8xbf16>, vector<8x8xf32> -> vector<8x8xf32>
    %81 = tpu.reciprocal %78 {approx = true} : vector<8x1xf32> -> vector<8x1xf32>
    %82 = vector.broadcast %81 : vector<8x1xf32> to vector<8x8xf32>
    %83 = arith.mulf %80, %82 : vector<8x8xf32>
    %84 = tpu.concatenate %20, %41, %62, %83 in 1 : vector<8x8xf32>, vector<8x8xf32>, vector<8x8xf32>, vector<8x8xf32> -> vector<8x32xf32>
    %c0_31 = arith.constant 0 : index
    %c0_32 = arith.constant 0 : index
    %85 = vector.load %arg2[%c0_31, %c0_32] : memref<8x32xf32, #tpu.memory_space<vmem>>, vector<8x32xf32>
    tpu.vector_store %arg2[%c0_31, %c0_32], %84 {strides = array<i32>} : memref<8x32xf32, #tpu.memory_space<vmem>>, vector<8x32xf32>,
    return
  }
  func.func @transform_0(%arg0: i32) -> (i32, i32) {
    %c0_i32 = arith.constant 0 : i32
    %c0_i32_0 = arith.constant 0 : i32
    return %arg0, %c0_i32 : i32, i32
  }
  func.func @transform_1(%arg0: i32) -> (i32, i32) {
    %c0_i32 = arith.constant 0 : i32
    %c0_i32_0 = arith.constant 0 : i32
    return %arg0, %c0_i32 : i32, i32
  }
}

module attributes {stable_mosaic.version = 11 : i64} {
  func.func @_act_quant_kernel(%arg0: i32, %arg1: memref<16x128xf32, #tpu.memory_space<vmem>>, %arg2: memref<16x128xbf16, #tpu.memory_space<vmem>>, %arg3: memref<16x1xf32, #tpu.memory_space<vmem>>) attributes {dimension_semantics = [#tpu.dimension_semantics<parallel>], iteration_bounds = array<i64: 1>, scalar_prefetch = 0 : i64, scratch_operands = 0 : i64, tpu.core_type = #tpu.core_type<tc>, window_params = [{transform_indices = @transform_0, window_bounds = array<i64: 16, 128>}, {transform_indices = @transform_1, window_bounds = array<i64: 16, 128>}, {transform_indices = @transform_2, window_bounds = array<i64: 16, 1>}]} {
    %c0 = arith.constant 0 : index
    %c0_0 = arith.constant 0 : index
    %0 = vector.load %arg1[%c0, %c0_0] : memref<16x128xf32, #tpu.memory_space<vmem>>, vector<16x128xf32>
    %1 = math.absf %0 : vector<16x128xf32>
    %cst = arith.constant dense<0xFF800000> : vector<16xf32>
    %2 = vector.multi_reduction <maximumf>, %1, %cst [1] : vector<16x128xf32> to vector<16xf32>
    %3 = vector.shape_cast %2 : vector<16xf32> to vector<16x1xf32>
    %cst_1 = arith.constant 9.99999974E-6 : f32
    %4 = vector.broadcast %cst_1 : f32 to vector<16x1xf32>
    %5 = arith.maximumf %3, %4 : vector<16x1xf32>
    %cst_2 = arith.constant 1.270000e+02 : f32
    %6 = vector.broadcast %cst_2 : f32 to vector<16x1xf32>
    %7 = arith.divf %6, %5 : vector<16x1xf32>
    %8 = vector.broadcast %7 : vector<16x1xf32> to vector<16x128xf32>
    %9 = arith.mulf %0, %8 : vector<16x128xf32>
    %10 = math.roundeven %9 : vector<16x128xf32>
    %cst_3 = arith.constant -1.280000e+02 : f32
    %cst_4 = arith.constant 1.270000e+02 : f32
    %11 = vector.broadcast %cst_3 : f32 to vector<16x128xf32>
    %12 = arith.maximumf %11, %10 : vector<16x128xf32>
    %13 = vector.broadcast %cst_4 : f32 to vector<16x128xf32>
    %14 = arith.minimumf %13, %12 : vector<16x128xf32>
    %15 = arith.truncf %14 : vector<16x128xf32> to vector<16x128xbf16>
    %c0_5 = arith.constant 0 : index
    %c0_6 = arith.constant 0 : index
    %16 = vector.load %arg2[%c0_5, %c0_6] : memref<16x128xbf16, #tpu.memory_space<vmem>>, vector<16x128xbf16>
    tpu.vector_store %arg2[%c0_5, %c0_6], %15 {strides = array<i32>} : memref<16x128xbf16, #tpu.memory_space<vmem>>, vector<16x128xbf16>,
    %c0_7 = arith.constant 0 : index
    %c0_8 = arith.constant 0 : index
    %17 = vector.load %arg3[%c0_7, %c0_8] : memref<16x1xf32, #tpu.memory_space<vmem>>, vector<16x1xf32>
    tpu.vector_store %arg3[%c0_7, %c0_8], %5 {strides = array<i32>} : memref<16x1xf32, #tpu.memory_space<vmem>>, vector<16x1xf32>,
    return
  }
  func.func @transform_0(%arg0: i32) -> (i32, i32) {
    %c0_i32 = arith.constant 0 : i32
    %c0_i32_0 = arith.constant 0 : i32
    return %arg0, %c0_i32 : i32, i32
  }
  func.func @transform_1(%arg0: i32) -> (i32, i32) {
    %c0_i32 = arith.constant 0 : i32
    %c0_i32_0 = arith.constant 0 : i32
    return %arg0, %c0_i32 : i32, i32
  }
  func.func @transform_2(%arg0: i32) -> (i32, i32) {
    %c0_i32 = arith.constant 0 : i32
    %c0_i32_0 = arith.constant 0 : i32
    return %arg0, %c0_i32 : i32, i32
  }
}

module attributes {stable_mosaic.version = 11 : i64} {
  func.func @_bit_matmul_kernel(%arg0: i32, %arg1: i32, %arg2: i32, %arg3: memref<16x32xbf16, #tpu.memory_space<vmem>>, %arg4: memref<32x32xbf16, #tpu.memory_space<vmem>>, %arg5: memref<16x1xf32, #tpu.memory_space<vmem>>, %arg6: memref<1x32xf32, #tpu.memory_space<vmem>>, %arg7: memref<1x32xf32, #tpu.memory_space<vmem>>, %arg8: memref<16x32xf32, #tpu.memory_space<vmem>>, %arg9: memref<16x32xf32, #tpu.memory_space<vmem>>, %arg10: memref<16x32xf32, #tpu.memory_space<vmem>>) attributes {dimension_semantics = [#tpu.dimension_semantics<parallel>, #tpu.dimension_semantics<parallel>, #tpu.dimension_semantics<arbitrary>], iteration_bounds = array<i64: 1, 1, 1>, scalar_prefetch = 0 : i64, scratch_operands = 1 : i64, tpu.core_type = #tpu.core_type<tc>, window_params = [{transform_indices = @transform_0, window_bounds = array<i64: 16, 32>}, {transform_indices = @transform_1, window_bounds = array<i64: 32, 32>}, {transform_indices = @transform_2, window_bounds = array<i64: 16, 1>}, {transform_indices = @transform_3, window_bounds = array<i64: 1, 32>}, {transform_indices = @transform_4, window_bounds = array<i64: 1, 32>}, {transform_indices = @transform_5, window_bounds = array<i64: 16, 32>}, {transform_indices = @transform_6, window_bounds = array<i64: 16, 32>}]} {
    %c0_i32 = arith.constant 0 : i32
    %0 = arith.cmpi eq, %arg2, %c0_i32 : i32
    %1 = arith.extui %0 : i1 to i32
    %c0_i32_0 = arith.constant 0 : i32
    %2 = arith.cmpi ne, %1, %c0_i32_0 : i32
    scf.if %2 {
      %cst_10 = arith.constant 0.000000e+00 : f32
      %12 = vector.broadcast %cst_10 : f32 to vector<16x32xf32>
      %c0_11 = arith.constant 0 : index
      %c0_12 = arith.constant 0 : index
      %13 = vector.load %arg10[%c0_11, %c0_12] : memref<16x32xf32, #tpu.memory_space<vmem>>, vector<16x32xf32>
      tpu.vector_store %arg10[%c0_11, %c0_12], %12 {strides = array<i32>} : memref<16x32xf32, #tpu.memory_space<vmem>>, vector<16x32xf32>,
    } else {
    }
    %c0 = arith.constant 0 : index
    %c0_1 = arith.constant 0 : index
    %3 = vector.load %arg10[%c0, %c0_1] : memref<16x32xf32, #tpu.memory_space<vmem>>, vector<16x32xf32>
    %c0_2 = arith.constant 0 : index
    %c0_3 = arith.constant 0 : index
    %4 = vector.load %arg3[%c0_2, %c0_3] : memref<16x32xbf16, #tpu.memory_space<vmem>>, vector<16x32xbf16>
    %c0_4 = arith.constant 0 : index
    %c0_5 = arith.constant 0 : index
    %5 = vector.load %arg4[%c0_4, %c0_5] : memref<32x32xbf16, #tpu.memory_space<vmem>>, vector<32x32xbf16>
    %cst = arith.constant dense<0.000000e+00> : vector<16x32xf32>
    %6 = tpu.matmul %4, %5, %cst {dimension_numbers = #tpu.dot_dimension_numbers<[1], [0], [0], [1], [0, 0, 1, 1], [], []>} : vector<16x32xbf16>, vector<32x32xbf16>, vector<16x32xf32> -> vector<16x32xf32>
    %7 = arith.addf %3, %6 : vector<16x32xf32>
    %c0_6 = arith.constant 0 : index
    %c0_7 = arith.constant 0 : index
    %8 = vector.load %arg10[%c0_6, %c0_7] : memref<16x32xf32, #tpu.memory_space<vmem>>, vector<16x32xf32>
    tpu.vector_store %arg10[%c0_6, %c0_7], %7 {strides = array<i32>} : memref<16x32xf32, #tpu.memory_space<vmem>>, vector<16x32xf32>,
    %c0_i32_8 = arith.constant 0 : i32
    %9 = arith.cmpi eq, %arg2, %c0_i32_8 : i32
    %10 = arith.extui %9 : i1 to i32
    %c0_i32_9 = arith.constant 0 : i32
    %11 = arith.cmpi ne, %10, %c0_i32_9 : i32
    scf.if %11 {
      %c0_10 = arith.constant 0 : index
      %c0_11 = arith.constant 0 : index
      %12 = vector.load %arg10[%c0_10, %c0_11] : memref<16x32xf32, #tpu.memory_space<vmem>>, vector<16x32xf32>
      %c0_12 = arith.constant 0 : index
      %c0_13 = arith.constant 0 : index
      %13 = vector.load %arg5[%c0_12, %c0_13] : memref<16x1xf32, #tpu.memory_space<vmem>>, vector<16x1xf32>
      %14 = vector.broadcast %13 : vector<16x1xf32> to vector<16x32xf32>
      %15 = arith.mulf %12, %14 : vector<16x32xf32>
      %c0_14 = arith.constant 0 : index
      %c0_15 = arith.constant 0 : index
      %16 = vector.load %arg6[%c0_14, %c0_15] : memref<1x32xf32, #tpu.memory_space<vmem>>, vector<1x32xf32>
      %17 = vector.broadcast %16 : vector<1x32xf32> to vector<16x32xf32>
      %18 = arith.mulf %15, %17 : vector<16x32xf32>
      %c0_16 = arith.constant 0 : index
      %c0_17 = arith.constant 0 : index
      %19 = vector.load %arg7[%c0_16, %c0_17] : memref<1x32xf32, #tpu.memory_space<vmem>>, vector<1x32xf32>
      %20 = vector.broadcast %19 : vector<1x32xf32> to vector<16x32xf32>
      %21 = arith.addf %18, %20 : vector<16x32xf32>
      %c0_18 = arith.constant 0 : index
      %c0_19 = arith.constant 0 : index
      %22 = vector.load %arg8[%c0_18, %c0_19] : memref<16x32xf32, #tpu.memory_space<vmem>>, vector<16x32xf32>
      %23 = arith.addf %21, %22 : vector<16x32xf32>
      %c0_20 = arith.constant 0 : index
      %c0_21 = arith.constant 0 : index
      %24 = vector.load %arg9[%c0_20, %c0_21] : memref<16x32xf32, #tpu.memory_space<vmem>>, vector<16x32xf32>
      tpu.vector_store %arg9[%c0_20, %c0_21], %23 {strides = array<i32>} : memref<16x32xf32, #tpu.memory_space<vmem>>, vector<16x32xf32>,
    } else {
    }
    return
  }
  func.func @transform_0(%arg0: i32, %arg1: i32, %arg2: i32) -> (i32, i32) {
    %c0_i32 = arith.constant 0 : i32
    return %arg0, %arg2 : i32, i32
  }
  func.func @transform_1(%arg0: i32, %arg1: i32, %arg2: i32) -> (i32, i32) {
    %c0_i32 = arith.constant 0 : i32
    return %arg2, %arg1 : i32, i32
  }
  func.func @transform_2(%arg0: i32, %arg1: i32, %arg2: i32) -> (i32, i32) {
    %c0_i32 = arith.constant 0 : i32
    %c0_i32_0 = arith.constant 0 : i32
    return %arg0, %c0_i32 : i32, i32
  }
  func.func @transform_3(%arg0: i32, %arg1: i32, %arg2: i32) -> (i32, i32) {
    %c0_i32 = arith.constant 0 : i32
    %c0_i32_0 = arith.constant 0 : i32
    return %c0_i32, %arg1 : i32, i32
  }
  func.func @transform_4(%arg0: i32, %arg1: i32, %arg2: i32) -> (i32, i32) {
    %c0_i32 = arith.constant 0 : i32
    %c0_i32_0 = arith.constant 0 : i32
    return %c0_i32, %arg1 : i32, i32
  }
  func.func @transform_5(%arg0: i32, %arg1: i32, %arg2: i32) -> (i32, i32) {
    %c0_i32 = arith.constant 0 : i32
    return %arg0, %arg1 : i32, i32
  }
  func.func @transform_6(%arg0: i32, %arg1: i32, %arg2: i32) -> (i32, i32) {
    %c0_i32 = arith.constant 0 : i32
    return %arg0, %arg1 : i32, i32
  }
}

module attributes {stable_mosaic.version = 11 : i64} {
  func.func @_bit_matmul_kernel(%arg0: i32, %arg1: i32, %arg2: i32, %arg3: memref<16x32xbf16, #tpu.memory_space<vmem>>, %arg4: memref<32x128xbf16, #tpu.memory_space<vmem>>, %arg5: memref<16x1xf32, #tpu.memory_space<vmem>>, %arg6: memref<1x128xf32, #tpu.memory_space<vmem>>, %arg7: memref<1x128xf32, #tpu.memory_space<vmem>>, %arg8: memref<16x128xf32, #tpu.memory_space<vmem>>, %arg9: memref<16x128xf32, #tpu.memory_space<vmem>>) attributes {dimension_semantics = [#tpu.dimension_semantics<parallel>, #tpu.dimension_semantics<parallel>, #tpu.dimension_semantics<arbitrary>], iteration_bounds = array<i64: 1, 1, 1>, scalar_prefetch = 0 : i64, scratch_operands = 1 : i64, tpu.core_type = #tpu.core_type<tc>, window_params = [{transform_indices = @transform_0, window_bounds = array<i64: 16, 32>}, {transform_indices = @transform_1, window_bounds = array<i64: 32, 128>}, {transform_indices = @transform_2, window_bounds = array<i64: 16, 1>}, {transform_indices = @transform_3, window_bounds = array<i64: 1, 128>}, {transform_indices = @transform_4, window_bounds = array<i64: 1, 128>}, {transform_indices = @transform_5, window_bounds = array<i64: 16, 128>}]} {
    %c0_i32 = arith.constant 0 : i32
    %0 = arith.cmpi eq, %arg2, %c0_i32 : i32
    %1 = arith.extui %0 : i1 to i32
    %c0_i32_0 = arith.constant 0 : i32
    %2 = arith.cmpi ne, %1, %c0_i32_0 : i32
    scf.if %2 {
      %cst_10 = arith.constant 0.000000e+00 : f32
      %12 = vector.broadcast %cst_10 : f32 to vector<16x128xf32>
      %c0_11 = arith.constant 0 : index
      %c0_12 = arith.constant 0 : index
      %13 = vector.load %arg9[%c0_11, %c0_12] : memref<16x128xf32, #tpu.memory_space<vmem>>, vector<16x128xf32>
      tpu.vector_store %arg9[%c0_11, %c0_12], %12 {strides = array<i32>} : memref<16x128xf32, #tpu.memory_space<vmem>>, vector<16x128xf32>,
    } else {
    }
    %c0 = arith.constant 0 : index
    %c0_1 = arith.constant 0 : index
    %3 = vector.load %arg9[%c0, %c0_1] : memref<16x128xf32, #tpu.memory_space<vmem>>, vector<16x128xf32>
    %c0_2 = arith.constant 0 : index
    %c0_3 = arith.constant 0 : index
    %4 = vector.load %arg3[%c0_2, %c0_3] : memref<16x32xbf16, #tpu.memory_space<vmem>>, vector<16x32xbf16>
    %c0_4 = arith.constant 0 : index
    %c0_5 = arith.constant 0 : index
    %5 = vector.load %arg4[%c0_4, %c0_5] : memref<32x128xbf16, #tpu.memory_space<vmem>>, vector<32x128xbf16>
    %cst = arith.constant dense<0.000000e+00> : vector<16x128xf32>
    %6 = tpu.matmul %4, %5, %cst {dimension_numbers = #tpu.dot_dimension_numbers<[1], [0], [0], [1], [0, 0, 1, 1], [], []>} : vector<16x32xbf16>, vector<32x128xbf16>, vector<16x128xf32> -> vector<16x128xf32>
    %7 = arith.addf %3, %6 : vector<16x128xf32>
    %c0_6 = arith.constant 0 : index
    %c0_7 = arith.constant 0 : index
    %8 = vector.load %arg9[%c0_6, %c0_7] : memref<16x128xf32, #tpu.memory_space<vmem>>, vector<16x128xf32>
    tpu.vector_store %arg9[%c0_6, %c0_7], %7 {strides = array<i32>} : memref<16x128xf32, #tpu.memory_space<vmem>>, vector<16x128xf32>,
    %c0_i32_8 = arith.constant 0 : i32
    %9 = arith.cmpi eq, %arg2, %c0_i32_8 : i32
    %10 = arith.extui %9 : i1 to i32
    %c0_i32_9 = arith.constant 0 : i32
    %11 = arith.cmpi ne, %10, %c0_i32_9 : i32
    scf.if %11 {
      %c0_10 = arith.constant 0 : index
      %c0_11 = arith.constant 0 : index
      %12 = vector.load %arg9[%c0_10, %c0_11] : memref<16x128xf32, #tpu.memory_space<vmem>>, vector<16x128xf32>
      %c0_12 = arith.constant 0 : index
      %c0_13 = arith.constant 0 : index
      %13 = vector.load %arg5[%c0_12, %c0_13] : memref<16x1xf32, #tpu.memory_space<vmem>>, vector<16x1xf32>
      %14 = vector.broadcast %13 : vector<16x1xf32> to vector<16x128xf32>
      %15 = arith.mulf %12, %14 : vector<16x128xf32>
      %c0_14 = arith.constant 0 : index
      %c0_15 = arith.constant 0 : index
      %16 = vector.load %arg6[%c0_14, %c0_15] : memref<1x128xf32, #tpu.memory_space<vmem>>, vector<1x128xf32>
      %17 = vector.broadcast %16 : vector<1x128xf32> to vector<16x128xf32>
      %18 = arith.mulf %15, %17 : vector<16x128xf32>
      %c0_16 = arith.constant 0 : index
      %c0_17 = arith.constant 0 : index
      %19 = vector.load %arg7[%c0_16, %c0_17] : memref<1x128xf32, #tpu.memory_space<vmem>>, vector<1x128xf32>
      %20 = vector.broadcast %19 : vector<1x128xf32> to vector<16x128xf32>
      %21 = arith.addf %18, %20 : vector<16x128xf32>
      %cst_18 = arith.constant 5.000000e-01 : f32
      %22 = vector.broadcast %cst_18 : f32 to vector<16x128xf32>
      %23 = arith.mulf %22, %21 : vector<16x128xf32>
      %cst_19 = arith.constant 4.471500e-02 : f32
      %24 = vector.broadcast %cst_19 : f32 to vector<16x128xf32>
      %25 = arith.mulf %24, %21 : vector<16x128xf32>
      %26 = arith.mulf %25, %21 : vector<16x128xf32>
      %27 = arith.mulf %26, %21 : vector<16x128xf32>
      %28 = arith.addf %21, %27 : vector<16x128xf32>
      %cst_20 = arith.constant 0.797884583 : f32
      %29 = vector.broadcast %cst_20 : f32 to vector<16x128xf32>
      %30 = arith.mulf %29, %28 : vector<16x128xf32>
      %31 = math.tanh %30 : vector<16x128xf32>
      %cst_21 = arith.constant 1.000000e+00 : f32
      %32 = vector.broadcast %cst_21 : f32 to vector<16x128xf32>
      %33 = arith.addf %32, %31 : vector<16x128xf32>
      %34 = arith.mulf %23, %33 : vector<16x128xf32>
      %c0_22 = arith.constant 0 : index
      %c0_23 = arith.constant 0 : index
      %35 = vector.load %arg8[%c0_22, %c0_23] : memref<16x128xf32, #tpu.memory_space<vmem>>, vector<16x128xf32>
      tpu.vector_store %arg8[%c0_22, %c0_23], %34 {strides = array<i32>} : memref<16x128xf32, #tpu.memory_space<vmem>>, vector<16x128xf32>,
    } else {
    }
    return
  }
  func.func @transform_0(%arg0: i32, %arg1: i32, %arg2: i32) -> (i32, i32) {
    %c0_i32 = arith.constant 0 : i32
    return %arg0, %arg2 : i32, i32
  }
  func.func @transform_1(%arg0: i32, %arg1: i32, %arg2: i32) -> (i32, i32) {
    %c0_i32 = arith.constant 0 : i32
    return %arg2, %arg1 : i32, i32
  }
  func.func @transform_2(%arg0: i32, %arg1: i32, %arg2: i32) -> (i32, i32) {
    %c0_i32 = arith.constant 0 : i32
    %c0_i32_0 = arith.constant 0 : i32
    return %arg0, %c0_i32 : i32, i32
  }
  func.func @transform_3(%arg0: i32, %arg1: i32, %arg2: i32) -> (i32, i32) {
    %c0_i32 = arith.constant 0 : i32
    %c0_i32_0 = arith.constant 0 : i32
    return %c0_i32, %arg1 : i32, i32
  }
  func.func @transform_4(%arg0: i32, %arg1: i32, %arg2: i32) -> (i32, i32) {
    %c0_i32 = arith.constant 0 : i32
    %c0_i32_0 = arith.constant 0 : i32
    return %c0_i32, %arg1 : i32, i32
  }
  func.func @transform_5(%arg0: i32, %arg1: i32, %arg2: i32) -> (i32, i32) {
    %c0_i32 = arith.constant 0 : i32
    return %arg0, %arg1 : i32, i32
  }
}

module attributes {stable_mosaic.version = 11 : i64} {
  func.func @_bit_matmul_kernel(%arg0: i32, %arg1: i32, %arg2: i32, %arg3: memref<16x128xbf16, #tpu.memory_space<vmem>>, %arg4: memref<128x32xbf16, #tpu.memory_space<vmem>>, %arg5: memref<16x1xf32, #tpu.memory_space<vmem>>, %arg6: memref<1x32xf32, #tpu.memory_space<vmem>>, %arg7: memref<1x32xf32, #tpu.memory_space<vmem>>, %arg8: memref<16x32xf32, #tpu.memory_space<vmem>>, %arg9: memref<16x32xf32, #tpu.memory_space<vmem>>, %arg10: memref<16x32xf32, #tpu.memory_space<vmem>>) attributes {dimension_semantics = [#tpu.dimension_semantics<parallel>, #tpu.dimension_semantics<parallel>, #tpu.dimension_semantics<arbitrary>], iteration_bounds = array<i64: 1, 1, 1>, scalar_prefetch = 0 : i64, scratch_operands = 1 : i64, tpu.core_type = #tpu.core_type<tc>, window_params = [{transform_indices = @transform_0, window_bounds = array<i64: 16, 128>}, {transform_indices = @transform_1, window_bounds = array<i64: 128, 32>}, {transform_indices = @transform_2, window_bounds = array<i64: 16, 1>}, {transform_indices = @transform_3, window_bounds = array<i64: 1, 32>}, {transform_indices = @transform_4, window_bounds = array<i64: 1, 32>}, {transform_indices = @transform_5, window_bounds = array<i64: 16, 32>}, {transform_indices = @transform_6, window_bounds = array<i64: 16, 32>}]} {
    %c0_i32 = arith.constant 0 : i32
    %0 = arith.cmpi eq, %arg2, %c0_i32 : i32
    %1 = arith.extui %0 : i1 to i32
    %c0_i32_0 = arith.constant 0 : i32
    %2 = arith.cmpi ne, %1, %c0_i32_0 : i32
    scf.if %2 {
      %cst_10 = arith.constant 0.000000e+00 : f32
      %12 = vector.broadcast %cst_10 : f32 to vector<16x32xf32>
      %c0_11 = arith.constant 0 : index
      %c0_12 = arith.constant 0 : index
      %13 = vector.load %arg10[%c0_11, %c0_12] : memref<16x32xf32, #tpu.memory_space<vmem>>, vector<16x32xf32>
      tpu.vector_store %arg10[%c0_11, %c0_12], %12 {strides = array<i32>} : memref<16x32xf32, #tpu.memory_space<vmem>>, vector<16x32xf32>,
    } else {
    }
    %c0 = arith.constant 0 : index
    %c0_1 = arith.constant 0 : index
    %3 = vector.load %arg10[%c0, %c0_1] : memref<16x32xf32, #tpu.memory_space<vmem>>, vector<16x32xf32>
    %c0_2 = arith.constant 0 : index
    %c0_3 = arith.constant 0 : index
    %4 = vector.load %arg3[%c0_2, %c0_3] : memref<16x128xbf16, #tpu.memory_space<vmem>>, vector<16x128xbf16>
    %c0_4 = arith.constant 0 : index
    %c0_5 = arith.constant 0 : index
    %5 = vector.load %arg4[%c0_4, %c0_5] : memref<128x32xbf16, #tpu.memory_space<vmem>>, vector<128x32xbf16>
    %cst = arith.constant dense<0.000000e+00> : vector<16x32xf32>
    %6 = tpu.matmul %4, %5, %cst {dimension_numbers = #tpu.dot_dimension_numbers<[1], [0], [0], [1], [0, 0, 1, 1], [], []>} : vector<16x128xbf16>, vector<128x32xbf16>, vector<16x32xf32> -> vector<16x32xf32>
    %7 = arith.addf %3, %6 : vector<16x32xf32>
    %c0_6 = arith.constant 0 : index
    %c0_7 = arith.constant 0 : index
    %8 = vector.load %arg10[%c0_6, %c0_7] : memref<16x32xf32, #tpu.memory_space<vmem>>, vector<16x32xf32>
    tpu.vector_store %arg10[%c0_6, %c0_7], %7 {strides = array<i32>} : memref<16x32xf32, #tpu.memory_space<vmem>>, vector<16x32xf32>,
    %c0_i32_8 = arith.constant 0 : i32
    %9 = arith.cmpi eq, %arg2, %c0_i32_8 : i32
    %10 = arith.extui %9 : i1 to i32
    %c0_i32_9 = arith.constant 0 : i32
    %11 = arith.cmpi ne, %10, %c0_i32_9 : i32
    scf.if %11 {
      %c0_10 = arith.constant 0 : index
      %c0_11 = arith.constant 0 : index
      %12 = vector.load %arg10[%c0_10, %c0_11] : memref<16x32xf32, #tpu.memory_space<vmem>>, vector<16x32xf32>
      %c0_12 = arith.constant 0 : index
      %c0_13 = arith.constant 0 : index
      %13 = vector.load %arg5[%c0_12, %c0_13] : memref<16x1xf32, #tpu.memory_space<vmem>>, vector<16x1xf32>
      %14 = vector.broadcast %13 : vector<16x1xf32> to vector<16x32xf32>
      %15 = arith.mulf %12, %14 : vector<16x32xf32>
      %c0_14 = arith.constant 0 : index
      %c0_15 = arith.constant 0 : index
      %16 = vector.load %arg6[%c0_14, %c0_15] : memref<1x32xf32, #tpu.memory_space<vmem>>, vector<1x32xf32>
      %17 = vector.broadcast %16 : vector<1x32xf32> to vector<16x32xf32>
      %18 = arith.mulf %15, %17 : vector<16x32xf32>
      %c0_16 = arith.constant 0 : index
      %c0_17 = arith.constant 0 : index
      %19 = vector.load %arg7[%c0_16, %c0_17] : memref<1x32xf32, #tpu.memory_space<vmem>>, vector<1x32xf32>
      %20 = vector.broadcast %19 : vector<1x32xf32> to vector<16x32xf32>
      %21 = arith.addf %18, %20 : vector<16x32xf32>
      %c0_18 = arith.constant 0 : index
      %c0_19 = arith.constant 0 : index
      %22 = vector.load %arg8[%c0_18, %c0_19] : memref<16x32xf32, #tpu.memory_space<vmem>>, vector<16x32xf32>
      %23 = arith.addf %21, %22 : vector<16x32xf32>
      %c0_20 = arith.constant 0 : index
      %c0_21 = arith.constant 0 : index
      %24 = vector.load %arg9[%c0_20, %c0_21] : memref<16x32xf32, #tpu.memory_space<vmem>>, vector<16x32xf32>
      tpu.vector_store %arg9[%c0_20, %c0_21], %23 {strides = array<i32>} : memref<16x32xf32, #tpu.memory_space<vmem>>, vector<16x32xf32>,
    } else {
    }
    return
  }
  func.func @transform_0(%arg0: i32, %arg1: i32, %arg2: i32) -> (i32, i32) {
    %c0_i32 = arith.constant 0 : i32
    return %arg0, %arg2 : i32, i32
  }
  func.func @transform_1(%arg0: i32, %arg1: i32, %arg2: i32) -> (i32, i32) {
    %c0_i32 = arith.constant 0 : i32
    return %arg2, %arg1 : i32, i32
  }
  func.func @transform_2(%arg0: i32, %arg1: i32, %arg2: i32) -> (i32, i32) {
    %c0_i32 = arith.constant 0 : i32
    %c0_i32_0 = arith.constant 0 : i32
    return %arg0, %c0_i32 : i32, i32
  }
  func.func @transform_3(%arg0: i32, %arg1: i32, %arg2: i32) -> (i32, i32) {
    %c0_i32 = arith.constant 0 : i32
    %c0_i32_0 = arith.constant 0 : i32
    return %c0_i32, %arg1 : i32, i32
  }
  func.func @transform_4(%arg0: i32, %arg1: i32, %arg2: i32) -> (i32, i32) {
    %c0_i32 = arith.constant 0 : i32
    %c0_i32_0 = arith.constant 0 : i32
    return %c0_i32, %arg1 : i32, i32
  }
  func.func @transform_5(%arg0: i32, %arg1: i32, %arg2: i32) -> (i32, i32) {
    %c0_i32 = arith.constant 0 : i32
    return %arg0, %arg1 : i32, i32
  }
  func.func @transform_6(%arg0: i32, %arg1: i32, %arg2: i32) -> (i32, i32) {
    %c0_i32 = arith.constant 0 : i32
    return %arg0, %arg1 : i32, i32
  }
}

</mosaic_0001>

<bundles_post_ra>
// kernel: transformer_forward.10
= control target key start
LH: loop header
LB: loop body
LE: loop exit
PB: predicated region body
PF: predicated region fallthrough
CT: control target
= control target key end

     0   :  { %v170_v0 = vmov 0.0   ;;  %vm171_vm0 = vmmov 0   ;;  %vm25_vm1 = vcmask 785408   ;;  %v172_v2 = vmov 0   ;;  %s236_s1 = inlined_call_operand.vmem [shape: bf16[32,96], index: 1, kind: input, shape index: {}]   ;;  %s237_s2 = inlined_call_operand.vmem [shape: f32[16,1], index: 2, kind: input, shape index: {}]   ;;  %s238_s0 = inlined_call_operand.vmem [shape: bf16[16,32], index: 0, kind: input, shape index: {}]   ;;  %s239_s3 = inlined_call_operand.vmem [shape: f32[1,96], index: 3, kind: input, shape index: {}]   ;;  %s240_s4 = inlined_call_operand.vmem [shape: f32[1,96], index: 4, kind: input, shape index: {}]   ;;  %s241_s5 = inlined_call_operand.vmem [shape: f32[16,96], index: 5, kind: output, shape index: {}]  }
   0x1   :  { %155 = vmatprep.subr.bf16.mxu0 %v170_v0  ;;  %v167_v1 = vld [vmem:[%s236_s1 + $0x8] sm:$0xff]   ;;  %159 = vmatprep.mubr.msk.bf16.mxu0 %vm171_vm0, %v170_v0  ;;  %26 = vst.msk [vmem:[#allocation2] sm:$0xff] %vm25_vm1, %v170_v0  ;;  %27 = vst.msk [vmem:[#allocation2 + $0x8] sm:$0xff] %vm25_vm1, %v170_v0  ;;  %v168_v3 = vld [vmem:[%s236_s1] sm:$0xff]   ;;  %vm53_vm2 = vcmask 261120  }
   0x2   :  { %166 = vset.pattern.permute.xlu0 %v172_v2  ;;  %156 = vmatpush3.bf16.msra.mxu0 %v167_v1  ;;  %v108_v4 = vld [vmem:[%s237_s2] sm:$0xff]  ;;  %v109_v6 = vld [vmem:[%s237_s2 + $0x8] sm:$0xff] }
   0x3   :  { %157 = vmatprep.subr.bf16.mxu0 %v170_v0  ;;  %112 = vperm.xlu0 %166, %v108_v4   ;;  %v169_v5 = vld [vmem:[%s238_s0] sm:$0xff]  }
   0x4   :  { %v150_v16 = vld [vmem:[%s239_s3] ss:$0 sm:$0xff] }
   0x5   :  { %v151_v19 = vld [vmem:[%s240_s4] ss:$0 sm:$0xff] }
   0x6   :  { %158 = vmatpush3.bf16.msra.mxu0 %v168_v3 }
   0x7   :  { %117 = vperm.xlu0 %166, %v109_v6  }
   0x8   :  { %v28_v7 = vld [vmem:[#allocation2] sm:$0xff]  ;;  %v29_v11 = vld [vmem:[#allocation2 + $0x8] sm:$0xff] }
   0x9   :  { %160 = vmatmul.mubr.msk.bf16.vlgmr.msra.gmra.mxu0 %vm53_vm2, %v169_v5 }
  0x7e   :  { %v113_v15 = vpop.permute.xlu0 %112 }
  0x82   :  { %v118_v21 = vpop.permute.xlu0 %117 }
  0xc9   :  { %v91_v8 = vpop.f32.mrf.mxu0 }
  0xca   :  { %v98_v9 = vadd.f32 %v91_v8, %v28_v7 }
  0xcb   :  { %v161_v10 = vpop.f32.mrf.mxu0 }
  0xcc   :  { %101 = vst.msk [vmem:[#allocation2] sm:$0xff] %vm25_vm1, %v98_v9 }
  0xcd   :  { %v94_v12 = vpop.f32.mrf.mxu0 }
  0xce   :  { %v99_v13 = vadd.f32 %v94_v12, %v29_v11 }
  0xcf   :  { %v162_v14 = vpop.f32.mrf.mxu0 }
  0xd0   :  { %102 = vst.msk [vmem:[#allocation2 + $0x8] sm:$0xff] %vm25_vm1, %v99_v13 }
  0xd3   :  { %v106_v17 = vld [vmem:[#allocation2] sm:$0xff] }
  0xd4   :  { %v120_v18 = vmul.f32 %v113_v15, %v106_v17 }
  0xd6   :  { %v129_v20 = vmul.f32 %v150_v16, %v120_v18 }
  0xd7   :  { %v107_v22 = vld [vmem:[#allocation2 + $0x8] sm:$0xff] }
  0xd8   :  { %v138_v23 = vadd.f32 %v151_v19, %v129_v20  ;;  %v121_v24 = vmul.f32 %v118_v21, %v107_v22 }
  0xda   :  { %140 = vst.msk [vmem:[%s241_s5] sm:$0xff] %vm25_vm1, %v138_v23  ;;  %v130_v25 = vmul.f32 %v150_v16, %v121_v24 }
  0xdc   :  { %v139_v26 = vadd.f32 %v151_v19, %v130_v25 }
  0xde   :  { %141 = vst.msk [vmem:[%s241_s5 + $0x8] sm:$0xff] %vm25_vm1, %v139_v26 }

// kernel: transformer_forward.12
= control target key start
LH: loop header
LB: loop body
LE: loop exit
PB: predicated region body
PF: predicated region fallthrough
CT: control target
= control target key end

     0   :  { %vm14_vm0 = vcmask 261120   ;;  %vm46_vm1 = vcmask 7168   ;;  %vm43_vm4 = vcmask 257024   ;;  %s114_s0 = inlined_call_operand.vmem [shape: f32[16,32], index: 0, kind: input, shape index: {}]   ;;  %s115_s2 = inlined_call_operand.vmem [shape: f32[16,1], index: 2, kind: output, shape index: {1}]   ;;  %s116_s1 = inlined_call_operand.vmem [shape: bf16[16,32], index: 1, kind: output, shape index: {0}]  }
   0x1   :  { %v10_v0 = vld [vmem:[%s114_s0] sm:$0xff]  ;;  %v11_v1 = vld [vmem:[%s114_s0 + $0x8] sm:$0xff] }
   0x2   :  { %v12_v2 = vand.u32 2147483647, %v10_v0  ;;  %v13_v3 = vand.u32 2147483647, %v11_v1 }
   0x4   :  { %v15_v4 = vsel %vm14_vm0, %v12_v2, -inf  ;;  %v18_v5 = vsel %vm14_vm0, %v13_v3, -inf }
   0x5   :  { %16 = vmax.xlane.f32.xlu0 %v15_v4 }
   0x9   :  { %19 = vmax.xlane.f32.xlu0 %v18_v5 }
  0x8e   :  { %v17_v6 = vpop.xlane.xlu0 %16 }
  0x8f   :  { %v21_v7 = vmax.f32 %v17_v6, 1e-05 }
  0x91   :  { %77 = vrcp.f32 %v21_v7  ;;  %47 = vst.msk [vmem:[%s115_s2] sm:$0xff] %vm46_vm1, %v21_v7 }
  0x92   :  { %v20_v8 = vpop.xlane.xlu0 %19 }
  0x93   :  { %v22_v9 = vmax.f32 %v20_v8, 1e-05 }
  0x95   :  { %79 = vrcp.f32 %v22_v9  ;;  %48 = vst.msk [vmem:[%s115_s2 + $0x8] sm:$0xff] %vm46_vm1, %v22_v9 }
  0x9e   :  { %v78_v10 = vpop.eup %77 }
  0x9f   :  { %v24_v11 = vmul.f32 127.0, %v78_v10 }
  0xa1   :  { %v27_v12 = vmul.f32 %v24_v11, %v10_v0 }
  0xa2   :  { %v80_v13 = vpop.eup %79 }
  0xa3   :  { %v63_v14 = vcvt.f32.s32 %v27_v12  ;;  %v26_v15 = vmul.f32 127.0, %v80_v13  ;;  %v61_v18 = vand.u32 2147483647, %v27_v12  ;;  %v66_v20 = vand.u32 2147483648, %v27_v12 }
  0xa5   :  { %v64_v16 = vcvt.s32.f32 %v63_v14  ;;  %v28_v17 = vmul.f32 %v26_v15, %v11_v1  ;;  %vm62_vm2 = vcmp.lt.f32.partialorder %v61_v18, 8388608.0 }
  0xa7   :  { %v65_v19 = vand.u32 2147483647, %v64_v16  ;;  %v71_v21 = vcvt.f32.s32 %v28_v17  ;;  %v69_v24 = vand.u32 2147483647, %v28_v17  ;;  %v74_v27 = vand.u32 2147483648, %v28_v17 }
  0xa9   :  { %v67_v22 = vor.u32 %v66_v20, %v65_v19  ;;  %v72_v23 = vcvt.s32.f32 %v71_v21  ;;  %vm70_vm3 = vcmp.lt.f32.partialorder %v69_v24, 8388608.0 }
  0xab   :  { %v68_v25 = vsel %vm62_vm2, %v67_v22, %v27_v12  ;;  %v73_v26 = vand.u32 2147483647, %v72_v23 }
  0xac   :  { %v31_v28 = vmax.f32 %v68_v25, -128.0 }
  0xad   :  { %v75_v29 = vor.u32 %v74_v27, %v73_v26 }
  0xae   :  { %v33_v30 = vmin.f32 %v31_v28, 127.0 }
  0xaf   :  { %v76_v31 = vsel %vm70_vm3, %v75_v29, %v28_v17 }
  0xb0   :  { %v59_v32 = vpack.c.bf16 %v33_v30, %v33_v30  ;;  %v32_v33 = vmax.f32 %v76_v31, -128.0 }
  0xb2   :  { %44 = vst.msk [vmem:[%s116_s1] sm:$0xf] %vm43_vm4, %v59_v32  ;;  %v34_v34 = vmin.f32 %v32_v33, 127.0 }
  0xb4   :  { %v60_v35 = vpack.c.bf16 %v34_v34, %v34_v34 }
  0xb6   :  { %45 = vst.msk [vmem:[%s116_s1 + $0x4] sm:$0xf] %vm43_vm4, %v60_v35 }

// kernel: transformer_forward.9
= control target key start
LH: loop header
LB: loop body
LE: loop exit
PB: predicated region body
PF: predicated region fallthrough
CT: control target
= control target key end

     0   :  { %8 = vsyncpa [#allocation3], 0  ;;  %s121_s9 = smov [#allocation2]   ;;  %s154_s0 = inlined_call_operand.hbm [shape: f32[16,32], index: 0, kind: input, shape index: {}]   ;;  %s155_s1 = inlined_call_operand.vmem [shape: bf16[16,32], index: 1, kind: output, shape index: {0}]   ;;  %s156_s2 = inlined_call_operand.vmem [shape: f32[16,1], index: 2, kind: output, shape index: {1}]  }
   0x1   :  { %s14_s10 = sshll.u32 %s121_s9, 4  ;;  %s15_s10 = int_to_ptr.vmem [resolvable:$true] %s14_s10 }
   0x2   :  { %s107_s11 = scalar_lea.vmem %s15_s10, 256  ;;  %p112_p1 = scmp.lt.s32.totalorder %s15_s10, %s15_s10 }
   0x3   :  { %p108_p0 = scmp.ne.s32.totalorder %s15_s10, %s107_s11  ;;  %p113_p2 = scmp.lt.s32.totalorder %s107_s11, %s107_s11 }
   0x5   :  { %p114_p3 = por %p113_p2, %p112_p1 }
   0x7   :  { %p115_p4 = pnand %p114_p3, %p108_p0 }
   0x9   :  { %118 = shalt.err (!%p115_p4)
}
   0xa   :  { %s122_s12 = smov 128   ;;  %s123_s13 = smov 8  }
   0xb   :  { %20 = dma.hbm_to_vmem [thread:$0]  %s154_s0, 256, %s15_s10, [#allocation3], %s122_s12, %s122_s12, %s123_s13  }
   0xc   :  { %119 = dma.done.wait [#allocation3], 256  }
   0xd   :  { %120 = vsyncadd [#allocation3], 4294967040  ;;  %v24_v0 = vld [vmem:[#allocation2] sm:$0xff]  ;;  %vm28_vm0 = vcmask 261120   ;;  %v25_v1 = vld [vmem:[#allocation2 + $0x8] sm:$0xff]  ;;  %vm60_vm1 = vcmask 7168  }
   0xe   :  { %v26_v2 = vand.u32 2147483647, %v24_v0  ;;  %v27_v3 = vand.u32 2147483647, %v25_v1  ;;  %vm57_vm4 = vcmask 257024  }
  0x10   :  { %v29_v4 = vsel %vm28_vm0, %v26_v2, -inf  ;;  %v32_v5 = vsel %vm28_vm0, %v27_v3, -inf }
  0x11   :  { %30 = vmax.xlane.f32.xlu0 %v29_v4 }
  0x15   :  { %33 = vmax.xlane.f32.xlu0 %v32_v5 }
  0x9a   :  { %v31_v6 = vpop.xlane.xlu0 %30 }
  0x9b   :  { %v35_v7 = vmax.f32 %v31_v6, 1e-05 }
  0x9d   :  { %95 = vrcp.f32 %v35_v7  ;;  %61 = vst.msk [vmem:[%s156_s2] sm:$0xff] %vm60_vm1, %v35_v7 }
  0x9e   :  { %v34_v8 = vpop.xlane.xlu0 %33 }
  0x9f   :  { %v36_v9 = vmax.f32 %v34_v8, 1e-05 }
  0xa1   :  { %97 = vrcp.f32 %v36_v9  ;;  %62 = vst.msk [vmem:[%s156_s2 + $0x8] sm:$0xff] %vm60_vm1, %v36_v9 }
  0xaa   :  { %v96_v10 = vpop.eup %95 }
  0xab   :  { %v38_v11 = vmul.f32 127.0, %v96_v10 }
  0xad   :  { %v41_v12 = vmul.f32 %v38_v11, %v24_v0 }
  0xae   :  { %v98_v13 = vpop.eup %97 }
  0xaf   :  { %v78_v14 = vcvt.f32.s32 %v41_v12  ;;  %v40_v15 = vmul.f32 127.0, %v98_v13  ;;  %v76_v18 = vand.u32 2147483647, %v41_v12  ;;  %v81_v20 = vand.u32 2147483648, %v41_v12 }
  0xb1   :  { %v79_v16 = vcvt.s32.f32 %v78_v14  ;;  %v42_v17 = vmul.f32 %v40_v15, %v25_v1  ;;  %vm77_vm2 = vcmp.lt.f32.partialorder %v76_v18, 8388608.0 }
  0xb3   :  { %v80_v19 = vand.u32 2147483647, %v79_v16  ;;  %v86_v21 = vcvt.f32.s32 %v42_v17  ;;  %v84_v24 = vand.u32 2147483647, %v42_v17  ;;  %v89_v27 = vand.u32 2147483648, %v42_v17 }
  0xb5   :  { %v82_v22 = vor.u32 %v81_v20, %v80_v19  ;;  %v87_v23 = vcvt.s32.f32 %v86_v21  ;;  %vm85_vm3 = vcmp.lt.f32.partialorder %v84_v24, 8388608.0 }
  0xb7   :  { %v83_v25 = vsel %vm77_vm2, %v82_v22, %v41_v12  ;;  %v88_v26 = vand.u32 2147483647, %v87_v23 }
  0xb8   :  { %v45_v28 = vmax.f32 %v83_v25, -128.0 }
  0xb9   :  { %v90_v29 = vor.u32 %v89_v27, %v88_v26 }
  0xba   :  { %v47_v30 = vmin.f32 %v45_v28, 127.0 }
  0xbb   :  { %v91_v31 = vsel %vm85_vm3, %v90_v29, %v42_v17 }
  0xbc   :  { %v74_v32 = vpack.c.bf16 %v47_v30, %v47_v30  ;;  %v46_v33 = vmax.f32 %v91_v31, -128.0 }
  0xbe   :  { %58 = vst.msk [vmem:[%s155_s1] sm:$0xf] %vm57_vm4, %v74_v32  ;;  %v48_v34 = vmin.f32 %v46_v33, 127.0 }
  0xc0   :  { %v75_v35 = vpack.c.bf16 %v48_v34, %v48_v34 }
  0xc2   :  { %59 = vst.msk [vmem:[%s155_s1 + $0x4] sm:$0xf] %vm57_vm4, %v75_v35 }
  0xc3   :  { %71 = vsyncpa [#allocation3], 1 }

// kernel: transformer_forward.11
= control target key start
LH: loop header
LB: loop body
LE: loop exit
PB: predicated region body
PF: predicated region fallthrough
CT: control target
= control target key end

     0   :  { %s786_s6 = smov 0   ;;  %s877_s0 = inlined_call_operand.vmem [shape: f32[16,96], index: 0, kind: input, shape index: {}]   ;;  %s878_s1 = inlined_call_operand.vmem [shape: f32[16,32], index: 1, kind: output, shape index: {}]  }
   0x1 LB: > { %s631_s7 = sadd.s32 4294967295, %s758_s6   ;;  %p635_p0 = scmp.ge.s32.totalorder %s758_s6, 1  ;;  %s758_s6 = sphi %s786_s6, %s11_s6  }
   0x2   : > { %p86_p1 = scmp.lt.s32.totalorder %s758_s6, 3 }
   0x4   : > { %p87_p2 = pnand %p635_p0, %p86_p1 }
   0x5   : > { %p104_p3 = scmp.lt.s32.totalorder (!%p87_p2), %s631_s7, 1  ;;  %s762_s12 = smov (!%p87_p2), 120  }
   0x6   : > { %90 = sbr.rel (%p87_p2) target bundleno = 1225 (0x4c9), region = 24  ;;  %s763_s13 = smov (!%p87_p2), 112  }
   0x7   : > { %s764_s14 = smov (!%p87_p2), 96   ;;  %s765_s15 = smov (!%p87_p2), 104  }
   0x8   : > { %s766_s16 = smov (!%p87_p2), 72   ;;  %s767_s17 = smov (!%p87_p2), 80  }
   0x9   : > { %s768_s18 = smov (!%p87_p2), 48   ;;  %s769_s19 = smov (!%p87_p2), 56  }
   0xa   : > { %s770_s20 = smov (!%p87_p2), 64   ;;  %s771_s21 = smov (!%p87_p2), 88  }
   0xb   : > { %v760_v0 = vmov 0.0   ;;  %vm761_vm0 = vmmov 0   ;;  %s880_s7 = smov (!%p104_p3, %s631_s7), 1  ;;  %vm120_vm1 = vcmask 64512   ;;  %vm182_vm2 = vcmask 1043456   ;;  %s772_s22 = smov 40  }
   0xc   : > { %664 = vmatprep.subr.bf16.mxu0 %v760_v0  ;;  %666 = vmatprep.mubr.msk.bf16.mxu0 %vm761_vm0, %v760_v0  ;;  %s636_s8 = sshll.u32 %s880_s7, 3  ;;  %s773_s23 = smov 8   ;;  %vm572_vm3 = vcmask 130048   ;;  %vm574_vm4 = vcmask 195584   ;;  %vm576_vm5 = vcmask 261120  }
   0xd   : > { %670 = vmatprep.subr.bf16.mxu1 %v760_v0  ;;  %672 = vmatprep.mubr.msk.bf16.mxu1 %vm761_vm0, %v760_v0  ;;  %s107_s11 = scalar_lea.vmem %s877_s0, %s636_s8  ;;  %s774_s24 = smov 16  }
   0xe   : > { %v113_v1 = vld [vmem:[%s107_s11] sm:$0xff]  ;;  %s775_s25 = smov 24   ;;  %s111_s28 = scalar_lea.vmem %s878_s1, %s636_s8 }
   0xf   : > { %v808_v2 = vpack.c.bf16 %v113_v1, %v113_v1  ;;  %v114_v5 = vmul.f32 0.35355338, %v113_v1 }
  0x11   : > { %118 = vrot.lane.b32.xlu0 %v808_v2, %s762_s12  ;;  %v115_v6 = vpack.c.bf16 %v114_v5, %v114_v5  ;;  %177 = vrot.lane.b32.xlu1 %v808_v2, %s763_s13 }
  0x15   : > { %231 = vrot.lane.b32.xlu1 %v808_v2, %s764_s14 }
  0x19   : > { %229 = vrot.lane.b32.xlu1 %v115_v6, %s765_s15 }
  0x1d   : > { %341 = vrot.lane.b32.xlu1 %v808_v2, %s766_s16 }
  0x21   : > { %339 = vrot.lane.b32.xlu1 %v115_v6, %s767_s17 }
  0x25   : > { %451 = vrot.lane.b32.xlu1 %v808_v2, %s768_s18 }
  0x29   : > { %449 = vrot.lane.b32.xlu1 %v115_v6, %s769_s19 }
  0x83   : > { %v119_v3 = vpop.permute.xlu0 %118  ;;  %v178_v12 = vpop.permute.xlu1 %177 }
  0x84   : > { %v125_v4 = vsel %vm120_vm1, %v119_v3, 0  ;;  %v184_v13 = vsel %vm182_vm2, %v178_v12, 0 }
  0x85   : > { %665 = vmatpush3.bf16.xpose.msra.mxu0 %v125_v4  ;;  %671 = vmatpush3.bf16.msra.mxu1 %v184_v13 }
  0x86   : > { %682 = vmatprep.subr.bf16.mxu0 %v760_v0  ;;  %676 = vmatprep.subr.bf16.mxu1 %v760_v0 }
  0x87   : > { %v232_v17 = vpop.permute.xlu1 %231 }
  0x88   : > { %v237_v20 = vsel %vm120_vm1, %v232_v17, 0 }
  0x8b   : > { %v230_v19 = vpop.permute.xlu1 %229 }
  0x8c   : > { %667 = vmatmul.mubr.msk.bf16.vlgmr.msra.gmra.mxu0 %vm120_vm1, %v115_v6 }
  0x8d   : > { %684 = vmatprep.mubr.msk.bf16.mxu0 %vm761_vm0, %v760_v0 }
  0x8f   : > { %v342_v22 = vpop.permute.xlu1 %341 }
  0x90   : > { %v347_v23 = vsel %vm120_vm1, %v342_v22, 0 }
  0x93   : > { %v340_v24 = vpop.permute.xlu1 %339 }
  0x97   : > { %v452_v25 = vpop.permute.xlu1 %451 }
  0x98   : > { %v457_v26 = vsel %vm120_vm1, %v452_v25, 0 }
  0x9b   : > { %v450_v27 = vpop.permute.xlu1 %449 }
 0x14c   : > { %v161_v7 = vpop.f32.mrf.mxu0 }
 0x14d   : > { %v167_v8 = vsel %vm120_vm1, %v161_v7, -inf }
 0x14e   : > { %168 = vmax.xlane.f32.xlu0 %v167_v8  ;;  %v668_v9 = vpop.f32.mrf.mxu0 }
 0x150   : > { %v164_v10 = vpop.f32.mrf.mxu0 }
 0x152   : > { %v669_v11 = vpop.f32.mrf.mxu0 }
 0x1d7   : > { %v169_v14 = vpop.xlane.xlu0 %168 }
 0x1d8   : > { %v170_v15 = vsub.f32 %v161_v7, %v169_v14 }
 0x1da   : > { %v171_v16 = vmul.f32 1.442695, %v170_v15 }
 0x1dc   : > { %736 = vpow2.f32 %v171_v16 }
 0x1e9   : > { %v823_v18 = vpop.eup %736 }
 0x1ea   : > { %v176_v21 = vpack.c.bf16 %v823_v18, %v823_v18  ;;  %v173_v8 = vsel %vm120_vm1, %v823_v18, 0.0 }
 0x1ec   : > { %673 = vmatmul.mubr.msk.bf16.vlgmr.msra.gmra.mxu1 %vm120_vm1, %v176_v21 }
 0x1ed   : > { %677 = vmatpush3.bf16.xpose.msra.mxu1 %v237_v20  ;;  %678 = vmatprep.mubr.msk.bf16.mxu1 %vm761_vm0, %v760_v0 }
 0x1ee   : > { %688 = vmatprep.subr.bf16.mxu1 %v760_v0 }
 0x1f4   : > { %679 = vmatmul.mubr.msk.bf16.vlgmr.msra.gmra.mxu1 %vm120_vm1, %v230_v19 }
 0x1f5   : > { %689 = vmatpush3.bf16.xpose.msra.mxu1 %v347_v23  ;;  %690 = vmatprep.mubr.msk.bf16.mxu1 %vm761_vm0, %v760_v0 }
 0x1f6   : > { %700 = vmatprep.subr.bf16.mxu1 %v760_v0 }
 0x1fc   : > { %691 = vmatmul.mubr.msk.bf16.vlgmr.msra.gmra.mxu1 %vm120_vm1, %v340_v24 }
 0x1fd   : > { %701 = vmatpush3.bf16.xpose.msra.mxu1 %v457_v26  ;;  %702 = vmatprep.mubr.msk.bf16.mxu1 %vm761_vm0, %v760_v0 }
 0x204   : > { %703 = vmatmul.mubr.msk.bf16.vlgmr.msra.gmra.mxu1 %vm120_vm1, %v450_v27 }
 0x2ac   : > { %v842_v28 = vpop.f32.mrf.mxu1 }
 0x2ae   : > { %v674_v29 = vpop.f32.mrf.mxu1 }
 0x2b0   : > { %v223_v30 = vpop.f32.mrf.mxu1 }
 0x2b2   : > { %v675_v31 = vpop.f32.mrf.mxu1 }
 0x2b4   : > { %v273_v32 = vpop.f32.mrf.mxu1 }
 0x2b5   : > { %v279_v33 = vsel %vm120_vm1, %v273_v32, -inf }
 0x2b6   : > { %280 = vmax.xlane.f32.xlu1 %v279_v33  ;;  %v680_v34 = vpop.f32.mrf.mxu1 }
 0x2b8   : > { %v276_v35 = vpop.f32.mrf.mxu1 }
 0x2ba   : > { %v681_v36 = vpop.f32.mrf.mxu1 }
 0x2bc   : > { %v383_v37 = vpop.f32.mrf.mxu1 }
 0x2bd   : > { %v389_v38 = vsel %vm120_vm1, %v383_v37, -inf }
 0x2be   : > { %390 = vmax.xlane.f32.xlu0 %v389_v38  ;;  %v692_v39 = vpop.f32.mrf.mxu1 }
 0x2c0   : > { %v386_v40 = vpop.f32.mrf.mxu1 }
 0x2c2   : > { %v693_v41 = vpop.f32.mrf.mxu1 }
 0x2c4   : > { %v493_v42 = vpop.f32.mrf.mxu1 }
 0x2c5   : > { %v499_v46 = vsel %vm120_vm1, %v493_v42, -inf }
 0x2c6   : > { %v704_v43 = vpop.f32.mrf.mxu1 }
 0x2c7   : > { %399 = vrot.lane.b32.xlu1 %v808_v2, %s770_s20 }
 0x2c8   : > { %v496_v44 = vpop.f32.mrf.mxu1 }
 0x2ca   : > { %v705_v45 = vpop.f32.mrf.mxu1 }
 0x2d4   : > { %289 = vrot.lane.b32.xlu0 %v808_v2, %s771_s21 }
 0x2f3   : > { %500 = vmax.xlane.f32.xlu0 %v499_v46 }
 0x309   : > { %509 = vrot.lane.b32.xlu0 %v808_v2, %s772_s22 }
 0x33f   : > { %v281_v47 = vpop.xlane.xlu1 %280 }
 0x340   : > { %v282_v48 = vsub.f32 %v273_v32, %v281_v47 }
 0x342   : > { %v283_v49 = vmul.f32 1.442695, %v282_v48 }
 0x343   : > { %v400_v55 = vpop.permute.xlu1 %399 }
 0x344   : > { %738 = vpow2.f32 %v283_v49  ;;  %v405_v59 = vsel %vm182_vm2, %v400_v55, 0 }
 0x347   : > { %v391_v50 = vpop.xlane.xlu0 %390 }
 0x348   : > { %v392_v51 = vsub.f32 %v383_v37, %v391_v50 }
 0x34a   : > { %v393_v52 = vmul.f32 1.442695, %v392_v51 }
 0x34b   : > { %v290_v53 = vpop.permute.xlu0 %289 }
 0x34c   : > { %740 = vpow2.f32 %v393_v52  ;;  %v295_v54 = vsel %vm182_vm2, %v290_v53, 0 }
 0x34d   : > { %683 = vmatpush3.bf16.msra.mxu0 %v295_v54 }
 0x34e   : > { %694 = vmatprep.subr.bf16.mxu0 %v760_v0 }
 0x351   : > { %v739_v56 = vpop.eup %738 }
 0x352   : > { %v285_v57 = vsel %vm120_vm1, %v739_v56, 0.0  ;;  %v288_v58 = vpack.c.bf16 %v739_v56, %v739_v56 }
 0x353   : > { %286 = vadd.xlane.f32.xlu0 %v285_v57 }
 0x354   : > { %685 = vmatmul.mubr.msk.bf16.vlgmr.msra.gmra.mxu0 %vm120_vm1, %v288_v58 }
 0x355   : > { %695 = vmatpush3.bf16.msra.mxu0 %v405_v59  ;;  %696 = vmatprep.mubr.msk.bf16.mxu0 %vm761_vm0, %v760_v0 }
 0x356   : > { %706 = vmatprep.subr.bf16.mxu0 %v760_v0 }
 0x359   : > { %v741_v60 = vpop.eup %740 }
 0x35a   : > { %v395_v61 = vsel %vm120_vm1, %v741_v60, 0.0  ;;  %v398_v62 = vpack.c.bf16 %v741_v60, %v741_v60 }
 0x35b   : > { %396 = vadd.xlane.f32.xlu1 %v395_v61 }
 0x35c   : > { %697 = vmatmul.mubr.msk.bf16.vlgmr.msra.gmra.mxu0 %vm120_vm1, %v398_v62 }
 0x35d   : > { %708 = vmatprep.mubr.msk.bf16.mxu0 %vm761_vm0, %v760_v0 }
 0x37c   : > { %v501_v63 = vpop.xlane.xlu0 %500 }
 0x37d   : > { %v502_v1 = vsub.f32 %v493_v42, %v501_v63 }
 0x37f   : > { %v503_v2 = vmul.f32 1.442695, %v502_v1 }
 0x380   : > { %v510_v3 = vpop.permute.xlu0 %509 }
 0x381   : > { %742 = vpow2.f32 %v503_v2  ;;  %v515_v4 = vsel %vm182_vm2, %v510_v3, 0 }
 0x382   : > { %707 = vmatpush3.bf16.msra.mxu0 %v515_v4 }
 0x38e   : > { %v743_v5 = vpop.eup %742 }
 0x38f   : > { %v505_v6 = vsel %vm120_vm1, %v743_v5, 0.0  ;;  %v508_v7 = vpack.c.bf16 %v743_v5, %v743_v5 }
 0x390   : > { %506 = vadd.xlane.f32.xlu0 %v505_v6 }
 0x391   : > { %709 = vmatmul.mubr.msk.bf16.vlgmr.msra.gmra.mxu0 %vm120_vm1, %v508_v7 }
 0x394   : > { %174 = vadd.xlane.f32.xlu0 %v173_v8 }
 0x3dc   : > { %v287_v0 = vpop.xlane.xlu0 %286 }
 0x3dd   : > { %744 = vrcp.f32 %v287_v0 }
 0x3e4   : > { %v397_v9 = vpop.xlane.xlu1 %396 }
 0x3e5   : > { %746 = vrcp.f32 %v397_v9 }
 0x3ea   : > { %v745_v10 = vpop.eup %744 }
 0x3f2   : > { %v747_v16 = vpop.eup %746 }
 0x414   : > { %v331_v11 = vpop.f32.mrf.mxu0 }
 0x415   : > { %v338_v12 = vmul.f32 %v745_v10, %v331_v11 }
 0x416   : > { %v686_v13 = vpop.f32.mrf.mxu0 }
 0x417   : > { %560 = vrot.lane.b32.xlu0 %v338_v12, %s773_s23 }
 0x418   : > { %v334_v14 = vpop.f32.mrf.mxu0 }
 0x419   : > { %v507_v22 = vpop.xlane.xlu0 %506 }
 0x41a   : > { %v687_v15 = vpop.f32.mrf.mxu0  ;;  %748 = vrcp.f32 %v507_v22 }
 0x41c   : > { %v441_v17 = vpop.f32.mrf.mxu0 }
 0x41d   : > { %v448_v19 = vmul.f32 %v747_v16, %v441_v17  ;;  %v175_v30 = vpop.xlane.xlu0 %174 }
 0x41e   : > { %v698_v20 = vpop.f32.mrf.mxu0  ;;  %750 = vrcp.f32 %v175_v30 }
 0x41f   : > { %564 = vrot.lane.b32.xlu1 %v448_v19, %s774_s24 }
 0x420   : > { %v444_v18 = vpop.f32.mrf.mxu0 }
 0x422   : > { %v699_v21 = vpop.f32.mrf.mxu0 }
 0x427   : > { %v749_v23 = vpop.eup %748 }
 0x42b   : > { %v751_v31 = vpop.eup %750 }
 0x42c   : > { %v227_v33 = vmul.f32 %v751_v31, %v842_v28 }
 0x451   : > { %v551_v24 = vpop.f32.mrf.mxu0 }
 0x452   : > { %v558_v25 = vmul.f32 %v749_v23, %v551_v24 }
 0x453   : > { %v710_v26 = vpop.f32.mrf.mxu0 }
 0x454   : > { %568 = vrot.lane.b32.xlu0 %v558_v25, %s775_s25 }
 0x455   : > { %v554_v27 = vpop.f32.mrf.mxu0 }
 0x457   : > { %v711_v29 = vpop.f32.mrf.mxu0 }
 0x489   : > { %v561_v32 = vpop.permute.xlu0 %560 }
 0x48a   : > { %v571_v35 = vsel %vm120_vm1, %v227_v33, %v561_v32 }
 0x491   : > { %v565_v34 = vpop.permute.xlu1 %564 }
 0x492   : > { %v573_v36 = vsel %vm572_vm3, %v571_v35, %v565_v34 }
 0x4c6   : > { %v569_v37 = vpop.permute.xlu0 %568 }
 0x4c7   : > { %v575_v38 = vsel %vm574_vm4, %v573_v36, %v569_v37 }
 0x4c8   : > { %577 = vst.msk [vmem:[%s111_s28] sm:$0xff] %vm576_vm5, %v575_v38 }
 0x4c9 PF: > { %s11_s6 = sadd.s32 1, %s758_s6  }
 0x4ca   : > { %p8_p4 = scmp.ge.s32.totalorder %s11_s6, 4  }
 0x4cc   :  { %10 = sbr.rel (!%p8_p4) target bundleno = 1 (0x1), region = 54 }

// kernel: transformer_forward.16
= control target key start
LH: loop header
LB: loop body
LE: loop exit
PB: predicated region body
PF: predicated region fallthrough
CT: control target
= control target key end

     0   :  { %vm42_vm0 = vcmask 7168   ;;  %s112_s0 = inlined_call_operand.vmem [shape: f32[16,128], index: 0, kind: input, shape index: {}]   ;;  %s113_s2 = inlined_call_operand.vmem [shape: f32[16,1], index: 2, kind: output, shape index: {1}]   ;;  %s114_s1 = inlined_call_operand.vmem [shape: bf16[16,128], index: 1, kind: output, shape index: {0}]  }
   0x1   :  { %v10_v0 = vld [vmem:[%s112_s0] sm:$0xff]  ;;  %v11_v1 = vld [vmem:[%s112_s0 + $0x8] sm:$0xff] }
   0x2   :  { %v12_v2 = vand.u32 2147483647, %v10_v0  ;;  %v13_v3 = vand.u32 2147483647, %v11_v1 }
   0x4   :  { %14 = vmax.xlane.f32.xlu0 %v12_v2 }
   0x8   :  { %16 = vmax.xlane.f32.xlu0 %v13_v3 }
  0x8d   :  { %v15_v4 = vpop.xlane.xlu0 %14 }
  0x8e   :  { %v18_v5 = vmax.f32 %v15_v4, 1e-05 }
  0x90   :  { %78 = vrcp.f32 %v18_v5  ;;  %43 = vst.msk [vmem:[%s113_s2] sm:$0xff] %vm42_vm0, %v18_v5 }
  0x91   :  { %v17_v6 = vpop.xlane.xlu0 %16 }
  0x92   :  { %v19_v7 = vmax.f32 %v17_v6, 1e-05 }
  0x94   :  { %80 = vrcp.f32 %v19_v7  ;;  %44 = vst.msk [vmem:[%s113_s2 + $0x8] sm:$0xff] %vm42_vm0, %v19_v7 }
  0x9d   :  { %v79_v8 = vpop.eup %78 }
  0x9e   :  { %v21_v9 = vmul.f32 127.0, %v79_v8 }
  0xa0   :  { %v24_v10 = vmul.f32 %v21_v9, %v10_v0 }
  0xa1   :  { %v81_v11 = vpop.eup %80 }
  0xa2   :  { %v64_v12 = vcvt.f32.s32 %v24_v10  ;;  %v23_v13 = vmul.f32 127.0, %v81_v11  ;;  %v62_v16 = vand.u32 2147483647, %v24_v10  ;;  %v67_v18 = vand.u32 2147483648, %v24_v10 }
  0xa4   :  { %v65_v14 = vcvt.s32.f32 %v64_v12  ;;  %v25_v15 = vmul.f32 %v23_v13, %v11_v1  ;;  %vm63_vm1 = vcmp.lt.f32.partialorder %v62_v16, 8388608.0 }
  0xa6   :  { %v66_v17 = vand.u32 2147483647, %v65_v14  ;;  %v72_v19 = vcvt.f32.s32 %v25_v15  ;;  %v70_v22 = vand.u32 2147483647, %v25_v15  ;;  %v75_v25 = vand.u32 2147483648, %v25_v15 }
  0xa8   :  { %v68_v20 = vor.u32 %v67_v18, %v66_v17  ;;  %v73_v21 = vcvt.s32.f32 %v72_v19  ;;  %vm71_vm2 = vcmp.lt.f32.partialorder %v70_v22, 8388608.0 }
  0xaa   :  { %v69_v23 = vsel %vm63_vm1, %v68_v20, %v24_v10  ;;  %v74_v24 = vand.u32 2147483647, %v73_v21 }
  0xab   :  { %v28_v27 = vmax.f32 %v69_v23, -128.0 }
  0xac   :  { %v76_v26 = vor.u32 %v75_v25, %v74_v24 }
  0xad   :  { %v30_v30 = vmin.f32 %v28_v27, 127.0 }
  0xae   :  { %v77_v28 = vsel %vm71_vm2, %v76_v26, %v25_v15 }
  0xaf   :  { %v29_v29 = vmax.f32 %v77_v28, -128.0 }
  0xb1   :  { %v31_v31 = vmin.f32 %v29_v29, 127.0 }
  0xb3   :  { %v60_v32 = vpack.c.bf16 %v31_v31, %v30_v30 }
  0xb5   :  { %61 = vst [vmem:[%s114_s1] sm:$0xff] %v60_v32  }

// kernel: transformer_forward.13
= control target key start
LH: loop header
LB: loop body
LE: loop exit
PB: predicated region body
PF: predicated region fallthrough
CT: control target
= control target key end

     0   :  { %vm28_vm0 = vcmask 261120   ;;  %v176_v0 = vmov 0.0   ;;  %vm177_vm1 = vmmov 0   ;;  %v178_v2 = vmov 0   ;;  %s254_s1 = inlined_call_operand.vmem [shape: bf16[32,32], index: 1, kind: input, shape index: {}]   ;;  %s255_s2 = inlined_call_operand.vmem [shape: f32[16,1], index: 2, kind: input, shape index: {}]   ;;  %s256_s0 = inlined_call_operand.vmem [shape: bf16[16,32], index: 0, kind: input, shape index: {}]   ;;  %s257_s3 = inlined_call_operand.vmem [shape: f32[1,32], index: 3, kind: input, shape index: {}]   ;;  %s258_s4 = inlined_call_operand.vmem [shape: f32[1,32], index: 4, kind: input, shape index: {}]   ;;  %s259_s5 = inlined_call_operand.vmem [shape: f32[16,32], index: 5, kind: input, shape index: {}]   ;;  %s260_s6 = inlined_call_operand.vmem [shape: f32[16,32], index: 6, kind: output, shape index: {}]  }
   0x1   :  { %161 = vmatprep.subr.bf16.mxu0 %v176_v0  ;;  %v173_v1 = vld [vmem:[%s254_s1 + $0x8] sm:$0xff]   ;;  %165 = vmatprep.mubr.msk.bf16.mxu0 %vm177_vm1, %v176_v0  ;;  %29 = vst.msk [vmem:[#allocation2] sm:$0xff] %vm28_vm0, %v176_v0  ;;  %30 = vst.msk [vmem:[#allocation2 + $0x8] sm:$0xff] %vm28_vm0, %v176_v0  ;;  %v174_v3 = vld [vmem:[%s254_s1] sm:$0xff]  }
   0x2   :  { %172 = vset.pattern.permute.xlu0 %v178_v2  ;;  %162 = vmatpush3.bf16.msra.mxu0 %v173_v1  ;;  %v110_v4 = vld [vmem:[%s255_s2] sm:$0xff]  ;;  %v111_v6 = vld [vmem:[%s255_s2 + $0x8] sm:$0xff] }
   0x3   :  { %163 = vmatprep.subr.bf16.mxu0 %v176_v0  ;;  %114 = vperm.xlu0 %172, %v110_v4   ;;  %v175_v5 = vld [vmem:[%s256_s0] sm:$0xff]   ;;  %v143_v28 = vld [vmem:[%s259_s5 + $0x8] sm:$0xff] }
   0x4   :  { %v156_v16 = vld [vmem:[%s257_s3] ss:$0 sm:$0xff] }
   0x5   :  { %v157_v19 = vld [vmem:[%s258_s4] ss:$0 sm:$0xff] }
   0x6   :  { %164 = vmatpush3.bf16.msra.mxu0 %v174_v3  ;;  %v142_v21 = vld [vmem:[%s259_s5] sm:$0xff] }
   0x7   :  { %119 = vperm.xlu0 %172, %v111_v6  }
   0x8   :  { %v31_v7 = vld [vmem:[#allocation2] sm:$0xff]  ;;  %v32_v11 = vld [vmem:[#allocation2 + $0x8] sm:$0xff] }
   0x9   :  { %166 = vmatmul.mubr.msk.bf16.vlgmr.msra.gmra.mxu0 %vm28_vm0, %v175_v5 }
  0x7e   :  { %v115_v15 = vpop.permute.xlu0 %114 }
  0x82   :  { %v120_v22 = vpop.permute.xlu0 %119 }
  0xc9   :  { %v94_v8 = vpop.f32.mrf.mxu0 }
  0xca   :  { %v101_v9 = vadd.f32 %v94_v8, %v31_v7 }
  0xcb   :  { %v167_v10 = vpop.f32.mrf.mxu0 }
  0xcc   :  { %103 = vst.msk [vmem:[#allocation2] sm:$0xff] %vm28_vm0, %v101_v9 }
  0xcd   :  { %v97_v12 = vpop.f32.mrf.mxu0 }
  0xce   :  { %v102_v13 = vadd.f32 %v97_v12, %v32_v11 }
  0xcf   :  { %v168_v14 = vpop.f32.mrf.mxu0 }
  0xd0   :  { %104 = vst.msk [vmem:[#allocation2 + $0x8] sm:$0xff] %vm28_vm0, %v102_v13 }
  0xd3   :  { %v108_v17 = vld [vmem:[#allocation2] sm:$0xff] }
  0xd4   :  { %v122_v18 = vmul.f32 %v115_v15, %v108_v17 }
  0xd6   :  { %v131_v20 = vmul.f32 %v156_v16, %v122_v18 }
  0xd7   :  { %v109_v23 = vld [vmem:[#allocation2 + $0x8] sm:$0xff] }
  0xd8   :  { %v140_v24 = vadd.f32 %v157_v19, %v131_v20  ;;  %v123_v25 = vmul.f32 %v120_v22, %v109_v23 }
  0xda   :  { %v144_v26 = vadd.f32 %v142_v21, %v140_v24  ;;  %v132_v27 = vmul.f32 %v156_v16, %v123_v25 }
  0xdc   :  { %146 = vst.msk [vmem:[%s260_s6] sm:$0xff] %vm28_vm0, %v144_v26  ;;  %v141_v29 = vadd.f32 %v157_v19, %v132_v27 }
  0xde   :  { %v145_v30 = vadd.f32 %v143_v28, %v141_v29 }
  0xe0   :  { %147 = vst.msk [vmem:[%s260_s6 + $0x8] sm:$0xff] %vm28_vm0, %v145_v30 }

// kernel: transformer_forward.15
= control target key start
LH: loop header
LB: loop body
LE: loop exit
PB: predicated region body
PF: predicated region fallthrough
CT: control target
= control target key end

     0   :  { %v190_v0 = vmov 0.0   ;;  %vm191_vm0 = vmmov 0   ;;  %v192_v2 = vmov 0   ;;  %vm52_vm1 = vcmask 261120   ;;  %s250_s1 = inlined_call_operand.vmem [shape: bf16[32,128], index: 1, kind: input, shape index: {}]   ;;  %s251_s2 = inlined_call_operand.vmem [shape: f32[16,1], index: 2, kind: input, shape index: {}]   ;;  %s252_s0 = inlined_call_operand.vmem [shape: bf16[16,32], index: 0, kind: input, shape index: {}]   ;;  %s253_s3 = inlined_call_operand.vmem [shape: f32[1,128], index: 3, kind: input, shape index: {}]   ;;  %s254_s4 = inlined_call_operand.vmem [shape: f32[1,128], index: 4, kind: input, shape index: {}]   ;;  %s255_s5 = inlined_call_operand.vmem [shape: f32[16,128], index: 5, kind: output, shape index: {}]  }
   0x1   :  { %171 = vmatprep.subr.bf16.mxu0 %v190_v0  ;;  %v183_v1 = vld [vmem:[%s250_s1 + $0x8] sm:$0xff]   ;;  %175 = vmatprep.mubr.msk.bf16.mxu0 %vm191_vm0, %v190_v0  ;;  %v184_v3 = vld [vmem:[%s250_s1] sm:$0xff]  }
   0x2   :  { %182 = vset.pattern.permute.xlu0 %v192_v2  ;;  %172 = vmatpush3.bf16.msra.mxu0 %v183_v1  ;;  %v106_v4 = vld [vmem:[%s251_s2] sm:$0xff]  ;;  %v107_v6 = vld [vmem:[%s251_s2 + $0x8] sm:$0xff] }
   0x3   :  { %173 = vmatprep.subr.bf16.mxu0 %v190_v0  ;;  %110 = vperm.xlu0 %182, %v106_v4   ;;  %v185_v5 = vld [vmem:[%s252_s0] sm:$0xff]  }
   0x4   :  { %v166_v9 = vld [vmem:[%s253_s3] ss:$0 sm:$0xff] }
   0x5   :  { %v167_v11 = vld [vmem:[%s254_s4] ss:$0 sm:$0xff] }
   0x6   :  { %174 = vmatpush3.bf16.msra.mxu0 %v184_v3 }
   0x7   :  { %115 = vperm.xlu0 %182, %v107_v6  }
   0x9   :  { %176 = vmatmul.mubr.msk.bf16.vlgmr.msra.gmra.mxu0 %vm52_vm1, %v185_v5 }
  0x7e   :  { %v111_v7 = vpop.permute.xlu0 %110 }
  0x82   :  { %v116_v14 = vpop.permute.xlu0 %115 }
  0xc9   :  { %v90_v8 = vpop.f32.mrf.mxu0 }
  0xca   :  { %v118_v10 = vmul.f32 %v111_v7, %v90_v8 }
  0xcb   :  { %v177_v12 = vpop.f32.mrf.mxu0 }
  0xcc   :  { %v127_v13 = vmul.f32 %v166_v9, %v118_v10 }
  0xcd   :  { %v93_v15 = vpop.f32.mrf.mxu0 }
  0xce   :  { %v136_v16 = vadd.f32 %v167_v11, %v127_v13  ;;  %v119_v17 = vmul.f32 %v116_v14, %v93_v15 }
  0xcf   :  { %v178_v18 = vpop.f32.mrf.mxu0 }
  0xd0   :  { %v140_v19 = vmul.f32 0.044715, %v136_v16  ;;  %v128_v20 = vmul.f32 %v166_v9, %v119_v17  ;;  %v138_v32 = vmul.f32 0.5, %v136_v16 }
  0xd2   :  { %v142_v21 = vmul.f32 %v140_v19, %v136_v16  ;;  %v137_v22 = vadd.f32 %v167_v11, %v128_v20 }
  0xd4   :  { %v144_v23 = vmul.f32 %v142_v21, %v136_v16  ;;  %v141_v24 = vmul.f32 0.044715, %v137_v22  ;;  %v139_v36 = vmul.f32 0.5, %v137_v22 }
  0xd6   :  { %v146_v25 = vadd.f32 %v144_v23, %v136_v16  ;;  %v143_v26 = vmul.f32 %v141_v24, %v137_v22 }
  0xd8   :  { %v148_v27 = vmul.f32 0.7978846, %v146_v25  ;;  %v145_v28 = vmul.f32 %v143_v26, %v137_v22 }
  0xda   :  { %186 = vtanh.f32 %v148_v27  ;;  %v147_v29 = vadd.f32 %v145_v28, %v137_v22 }
  0xdc   :  { %v149_v30 = vmul.f32 0.7978846, %v147_v29 }
  0xde   :  { %188 = vtanh.f32 %v149_v30 }
  0xe7   :  { %v187_v31 = vpop.eup %186 }
  0xe8   :  { %v152_v33 = vadd.f32 1.0, %v187_v31 }
  0xea   :  { %v154_v34 = vmul.f32 %v152_v33, %v138_v32 }
  0xeb   :  { %v189_v35 = vpop.eup %188 }
  0xec   :  { %156 = vst [vmem:[%s255_s5] sm:$0xff] %v154_v34  ;;  %v153_v37 = vadd.f32 1.0, %v189_v35 }
  0xee   :  { %v155_v38 = vmul.f32 %v153_v37, %v139_v36 }
  0xf0   :  { %157 = vst [vmem:[%s255_s5 + $0x8] sm:$0xff] %v155_v38 }

// kernel: transformer_forward.17
= control target key start
LH: loop header
LB: loop body
LE: loop exit
PB: predicated region body
PF: predicated region fallthrough
CT: control target
= control target key end

     0   :  { %v289_v1 = vmov 0.0   ;;  %vm290_vm0 = vmmov 0   ;;  %v291_v3 = vmov 0   ;;  %vm29_vm1 = vcmask 261120   ;;  %s384_s0 = inlined_call_operand.vmem [shape: bf16[16,128], index: 0, kind: input, shape index: {}]   ;;  %s385_s1 = inlined_call_operand.vmem [shape: bf16[128,32], index: 1, kind: input, shape index: {}]   ;;  %s386_s2 = inlined_call_operand.vmem [shape: f32[16,1], index: 2, kind: input, shape index: {}]   ;;  %s387_s3 = inlined_call_operand.vmem [shape: f32[1,32], index: 3, kind: input, shape index: {}]   ;;  %s388_s4 = inlined_call_operand.vmem [shape: f32[1,32], index: 4, kind: input, shape index: {}]   ;;  %s389_s5 = inlined_call_operand.vmem [shape: f32[16,32], index: 5, kind: input, shape index: {}]   ;;  %s390_s6 = inlined_call_operand.hbm [shape: f32[16,32], index: 6, kind: output, shape index: {}]  }
   0x1   :  { %v258_v0 = vld [vmem:[%s385_s1 + $0x38] sm:$0xff]   ;;  %231 = vmatprep.subr.bf16.mxu0 %v289_v1  ;;  %v259_v2 = vld [vmem:[%s385_s1 + $0x30] sm:$0xff]   ;;  %247 = vmatprep.mubr.msk.bf16.mxu0 %vm290_vm0, %v289_v1  ;;  %30 = vst.msk [vmem:[#allocation2] sm:$0xff] %vm29_vm1, %v289_v1  ;;  %31 = vst.msk [vmem:[#allocation2 + $0x8] sm:$0xff] %vm29_vm1, %v289_v1 }
   0x2   :  { %232 = vmatpush3.bf16.msra.mxu0 %v258_v0  ;;  %257 = vset.pattern.permute.xlu0 %v291_v3  ;;  %v260_v4 = vld [vmem:[%s385_s1 + $0x28] sm:$0xff]   ;;  %v157_v5 = vld [vmem:[%s386_s2] sm:$0xff] }
   0x3   :  { %233 = vmatprep.subr.bf16.mxu0 %v289_v1 }
   0x6   :  { %234 = vmatpush3.bf16.msra.mxu0 %v259_v2 }
   0x7   :  { %235 = vmatprep.subr.bf16.mxu0 %v289_v1 }
   0x8   :  { %11 = vsyncpa [#allocation4], 0  ;;  %v261_v6 = vld [vmem:[%s385_s1 + $0x20] sm:$0xff]   ;;  %161 = vperm.xlu0 %257, %v157_v5   ;;  %v158_v7 = vld [vmem:[%s386_s2 + $0x8] sm:$0xff]  ;;  %s292_s22 = smov [#allocation3]  }
   0x9   :  { %v262_v8 = vld [vmem:[%s385_s1 + $0x18] sm:$0xff]   ;;  %v263_v9 = vld [vmem:[%s385_s1 + $0x10] sm:$0xff]   ;;  %v264_v10 = vld [vmem:[%s385_s1 + $0x8] sm:$0xff]   ;;  %s200_s23 = sshll.u32 %s292_s22, 4  ;;  %s201_s23 = int_to_ptr.vmem [resolvable:$true] %s200_s23 }
   0xa   :  { %236 = vmatpush3.bf16.msra.mxu0 %v260_v4  ;;  %v265_v11 = vld [vmem:[%s385_s1] sm:$0xff]   ;;  %v33_v17 = vld [vmem:[#allocation2 + $0x8] sm:$0xff]  ;;  %p272_p1 = scmp.lt.s32.totalorder %s201_s23, %s201_s23 }
   0xb   :  { %237 = vmatprep.subr.bf16.mxu0 %v289_v1  ;;  %v266_v12 = vld [vmem:[%s384_s0] sm:$0xff]   ;;  %v190_v34 = vld [vmem:[%s389_s5 + $0x8] sm:$0xff] }
   0xc   :  { %166 = vperm.xlu0 %257, %v158_v7   ;;  %v32_v13 = vld [vmem:[#allocation2] sm:$0xff] }
   0xd   :  { %v220_v22 = vld [vmem:[%s387_s3] ss:$0 sm:$0xff] }
   0xe   :  { %238 = vmatpush3.bf16.msra.mxu0 %v261_v6  ;;  %v221_v25 = vld [vmem:[%s388_s4] ss:$0 sm:$0xff]  ;;  %s267_s4 = scalar_lea.vmem %s201_s23, 256 }
   0xf   :  { %239 = vmatprep.subr.bf16.mxu0 %v289_v1  ;;  %v189_v27 = vld [vmem:[%s389_s5] sm:$0xff]  ;;  %p268_p0 = scmp.ne.s32.totalorder %s201_s23, %s267_s4  ;;  %p273_p2 = scmp.lt.s32.totalorder %s267_s4, %s267_s4 }
  0x11   :  { %p274_p3 = por %p273_p2, %p272_p1 }
  0x12   :  { %240 = vmatpush3.bf16.msra.mxu0 %v262_v8 }
  0x13   :  { %241 = vmatprep.subr.bf16.mxu0 %v289_v1  ;;  %p275_p4 = pnand %p274_p3, %p268_p0 }
  0x16   :  { %242 = vmatpush3.bf16.msra.mxu0 %v263_v9 }
  0x17   :  { %243 = vmatprep.subr.bf16.mxu0 %v289_v1 }
  0x1a   :  { %244 = vmatpush3.bf16.msra.mxu0 %v264_v10 }
  0x1b   :  { %245 = vmatprep.subr.bf16.mxu0 %v289_v1 }
  0x1e   :  { %246 = vmatpush3.bf16.msra.mxu0 %v265_v11 }
  0x21   :  { %248 = vmatmul.mubr.bf16.vlgmr.msra.gmra.mxu0 %v266_v12 }
  0x83   :  { %v162_v21 = vpop.permute.xlu0 %161 }
  0x87   :  { %v167_v28 = vpop.permute.xlu0 %166 }
  0xe1   :  { %v140_v14 = vpop.f32.mrf.mxu0 }
  0xe2   :  { %v147_v15 = vadd.f32 %v140_v14, %v32_v13 }
  0xe3   :  { %v249_v16 = vpop.f32.mrf.mxu0 }
  0xe4   :  { %150 = vst.msk [vmem:[#allocation2] sm:$0xff] %vm29_vm1, %v147_v15 }
  0xe5   :  { %v143_v18 = vpop.f32.mrf.mxu0 }
  0xe6   :  { %v148_v19 = vadd.f32 %v143_v18, %v33_v17 }
  0xe7   :  { %v250_v20 = vpop.f32.mrf.mxu0 }
  0xe8   :  { %151 = vst.msk [vmem:[#allocation2 + $0x8] sm:$0xff] %vm29_vm1, %v148_v19 }
  0xeb   :  { %v155_v23 = vld [vmem:[#allocation2] sm:$0xff] }
  0xec   :  { %v169_v24 = vmul.f32 %v162_v21, %v155_v23 }
  0xee   :  { %v178_v26 = vmul.f32 %v220_v22, %v169_v24 }
  0xef   :  { %v156_v29 = vld [vmem:[#allocation2 + $0x8] sm:$0xff] }
  0xf0   :  { %v187_v30 = vadd.f32 %v221_v25, %v178_v26  ;;  %v170_v31 = vmul.f32 %v167_v28, %v156_v29 }
  0xf2   :  { %v191_v32 = vadd.f32 %v189_v27, %v187_v30  ;;  %v179_v33 = vmul.f32 %v220_v22, %v170_v31 }
  0xf4   :  { %193 = vst.msk [vmem:[#allocation3] sm:$0xff] %vm29_vm1, %v191_v32  ;;  %v188_v35 = vadd.f32 %v221_v25, %v179_v33 }
  0xf6   :  { %v192_v36 = vadd.f32 %v190_v34, %v188_v35 }
  0xf8   :  { %194 = vst.msk [vmem:[#allocation3 + $0x8] sm:$0xff] %vm29_vm1, %v192_v36 }
  0xf9   :  { %278 = shalt.err (!%p275_p4)
}
  0xfa   :  { %s293_s25 = smov 128   ;;  %s294_s26 = smov 8  }
  0xfb   :  { %206 = dma.vmem_to_hbm [thread:$0]  %s201_s23, 256, %s390_s6, [#allocation4], %s293_s25, %s293_s25, %s294_s26  }
  0xfc   :  { %287 = dma.done.wait [#allocation4], 256  }
  0xfd   :  { %288 = vsyncadd [#allocation4], 4294967040 }
  0xfe   :  { %210 = vsyncpa [#allocation4], 1 }

</bundles_post_ra>
